<compile_context>
chip_gen: v5e
topology: v5e:2x2
jax: 0.10.0
libtpu: 0.0.40
codegen_flags: <defaults>
</compile_context>

<pallas_src>
import functools
import math

import jax
import jax.numpy as jnp
from jax import lax
from jax.experimental import pallas as pl
from jax.experimental.pallas import tpu as pltpu

_BN_EPS = 1e-5
_SLOPE = 0.2          # LeakyReLU negative slope
_HALO = 8             # top-halo rows -> active region starts sublane-aligned


def _rows(t):
    """Scratch rows for a stage with t active rows: 8-row top halo + active +
    >=1 zero bottom-pad row, rounded up to a multiple of 8."""
    return _HALO + ((t + 1 + 7) // 8) * 8


def _leaky(v):
    return jnp.where(v > 0, v, _SLOPE * v)


# ----------------------------------------------------------------------------
# Whole-encoder fused kernel.  One grid step == one batch element.
# ----------------------------------------------------------------------------
def _encoder_kernel(x_ref,
                    pw_ref, psh_ref,
                    r1w_ref, r1sh_ref, d1w_ref, d1sh_ref,
                    r2w_ref, r2sh_ref, d2w_ref, d2sh_ref,
                    r3w_ref, r3sh_ref, d3w_ref, d3sh_ref,
                    r4w_ref, r4sh_ref,
                    pqw_ref, pqb_ref,
                    out1_ref, out2_ref, out3_ref, out4_ref, pre_ref,
                    hs1, hs2, hs3, hs4,
                    *, T, n_res):

    def init_halo(hs, t):
        # Zero only the halo rows (row _HALO-1 = left pad, row _HALO+t = right
        # pad + alignment tail); interior is fully overwritten before any read.
        c = hs.shape[1]
        tail = hs.shape[0] - _HALO - t
        hs[pl.ds(0, _HALO), :] = jnp.zeros((_HALO, c), jnp.float32)
        hs[pl.ds(_HALO + t, tail), :] = jnp.zeros((tail, c), jnp.float32)

    def res_stack(hs, t, rw_ref, rsh_ref, out_ref):
        # n_res identity-residual ConvNormRelu(k=3, s=1, p=1) layers; im2col ->
        # one (t, 3C) @ (3C, C) MXU matmul per layer.  All taps are read before
        # the in-place store (no layer aliasing).
        cur = hs[pl.ds(_HALO, t), :]
        for l in range(n_res):
            left = hs[pl.ds(_HALO - 1, t), :]
            right = hs[pl.ds(_HALO + 1, t), :]
            win = jnp.concatenate([left, cur, right], axis=-1)
            y = jnp.dot(win, rw_ref[l], preferred_element_type=jnp.float32)
            cur = _leaky(y + rsh_ref[l] + cur)
            hs[pl.ds(_HALO, t), :] = cur            # sublane-aligned store
        out_ref[0] = cur.astype(out_ref.dtype)
        return cur

    def down_stage(hs_prev, t_prev, dw_ref, dsh_ref, hs_next, t_next):
        # k=4 / s=2 / p=1 conv (BN + parallel residual conv pre-folded into dw).
        # Stride-2 de-interleave done in VMEM with 0/1 selection matmuls (no
        # strided slices), then one (t/2, 4C) @ (4C, Cout) matmul.
        tp2 = t_prev + 2
        xp = hs_prev[pl.ds(_HALO - 1, tp2), :]      # padded input, contiguous
        rows_i = lax.broadcasted_iota(jnp.int32, (t_next, tp2), 0)
        cols_i = lax.broadcasted_iota(jnp.int32, (t_next, tp2), 1)
        taps = []
        for k in range(4):                           # tap k picks xp[2j + k]
            sel = (cols_i == 2 * rows_i + k).astype(jnp.float32)
            taps.append(jnp.dot(sel, xp, preferred_element_type=jnp.float32))
        win = jnp.concatenate(taps, axis=-1)         # (t_next, 4*C_prev)
        y = _leaky(jnp.dot(win, dw_ref[...],
                           preferred_element_type=jnp.float32) + dsh_ref[...])
        init_halo(hs_next, t_next)
        hs_next[pl.ds(_HALO, t_next), :] = y

    # ---- stage 1: project (k=3, s=1, p=1) + enc_1 ---------------------------
    init_halo(hs1, T)
    win = jnp.concatenate([x_ref[0, pl.ds(0, T), :],
                           x_ref[0, pl.ds(1, T), :],
                           x_ref[0, pl.ds(2, T), :]], axis=-1)
    h = _leaky(jnp.dot(win, pw_ref[...], preferred_element_type=jnp.float32)
               + psh_ref[...])
    hs1[pl.ds(_HALO, T), :] = h
    res_stack(hs1, T, r1w_ref, r1sh_ref, out1_ref)

    # ---- stages 2..4: down_i + enc_{i+1} ------------------------------------
    T2, T4, T8 = T // 2, T // 4, T // 8
    down_stage(hs1, T, d1w_ref, d1sh_ref, hs2, T2)
    res_stack(hs2, T2, r2w_ref, r2sh_ref, out2_ref)

    down_stage(hs2, T2, d2w_ref, d2sh_ref, hs3, T4)
    res_stack(hs3, T4, r3w_ref, r3sh_ref, out3_ref)

    down_stage(hs3, T4, d3w_ref, d3sh_ref, hs4, T8)
    h4 = res_stack(hs4, T8, r4w_ref, r4sh_ref, out4_ref)

    # ---- fused 1x1 pre-VQ conv ----------------------------------------------
    pre_ref[0] = (jnp.dot(h4, pqw_ref[...], preferred_element_type=jnp.float32)
                  + pqb_ref[...]).astype(pre_ref.dtype)


# ----------------------------------------------------------------------------
# Parameter folding helpers (plain JAX under jit; weights are tiny)
# ----------------------------------------------------------------------------
def _fold_bn(p):
    """Fold inference-mode BN into conv weight / per-channel shift."""
    s = p['gamma'] / jnp.sqrt(p['var'] + _BN_EPS)
    w = p['w'] * s[None, None, :]
    shift = (p['b'] - p['mean']) * s + p['beta']
    return w, shift


def _fold_down(p):
    """Fold BN *and* the parallel residual Conv1d into one conv."""
    w, shift = _fold_bn(p)
    return w + p['res_w'], shift + p['res_b']


def _im2col_w(w):
    k, cin, cout = w.shape
    return w.reshape(k * cin, cout)        # tap-major rows == in-kernel concat


def _stack_res(layers):
    ws, shs = zip(*[_fold_bn(p) for p in layers])
    ws = jnp.stack([_im2col_w(w) for w in ws])        # (L, 3C, C)
    shs = jnp.stack(shs)[:, None, :]                   # (L, 1, C)
    return ws, shs


# ----------------------------------------------------------------------------
# EncoderSC forward (inputs / outputs in PyTorch NCT layout)
# ----------------------------------------------------------------------------
def encoder_sc_forward(params, x_nct):
    x = jnp.transpose(x_nct, (0, 2, 1)).astype(jnp.float32)   # NCT -> NTC
    B, T, cin = x.shape
    assert T % 8 == 0, "T must be divisible by 8 (three stride-2 downsamples)"
    n_res = len(params['enc_1'])

    # ---- fold BN (+ residual conv) into lane-concat im2col weights ----------
    cin_pad = ((cin + 7) // 8) * 8                  # ragged Cin -> 8 sublanes
    pw, psh = _fold_bn(params['project'])
    pw = jnp.pad(pw, ((0, 0), (0, cin_pad - cin), (0, 0)))
    c1 = pw.shape[-1]
    pw = _im2col_w(pw)

    r1w, r1sh = _stack_res(params['enc_1'])
    r2w, r2sh = _stack_res(params['enc_2'])
    r3w, r3sh = _stack_res(params['enc_3'])
    r4w, r4sh = _stack_res(params['enc_4'])

    d1w, d1sh = _fold_down(params['down_1']); d1w = _im2col_w(d1w)
    d2w, d2sh = _fold_down(params['down_2']); d2w = _im2col_w(d2w)
    d3w, d3sh = _fold_down(params['down_3']); d3w = _im2col_w(d3w)
    c2, c3 = d2w.shape[-1], d3w.shape[-1]

    pqw = params['pre_vq']['w'][0]
    pqb = params['pre_vq']['b'][None, :]
    emb = pqw.shape[-1]
    psh, d1sh, d2sh, d3sh = (a[None, :] for a in (psh, d1sh, d2sh, d3sh))

    # single pad of the only HBM input: time halo (+1/-1) and channel pad
    x_prep = jnp.pad(x, ((0, 0), (1, 1), (0, cin_pad - cin)))

    T2, T4, T8 = T // 2, T // 4, T // 8
    weights = [pw, psh, r1w, r1sh, d1w, d1sh, r2w, r2sh, d2w, d2sh,
               r3w, r3sh, d3w, d3sh, r4w, r4sh, pqw, pqb]
    weights = [w.astype(jnp.float32) for w in weights]

    def _wspec(a):
        zeros = (0,) * a.ndim
        return pl.BlockSpec(a.shape, lambda b: zeros)

    out_shapes = (jax.ShapeDtypeStruct((B, T, c1), jnp.float32),
                  jax.ShapeDtypeStruct((B, T2, c1), jnp.float32),
                  jax.ShapeDtypeStruct((B, T4, c2), jnp.float32),
                  jax.ShapeDtypeStruct((B, T8, c3), jnp.float32),
                  jax.ShapeDtypeStruct((B, T8, emb), jnp.float32))

    out1, out2, out3, out4, pre = pl.pallas_call(
        functools.partial(_encoder_kernel, T=T, n_res=n_res),
        out_shape=out_shapes,
        grid=(B,),                                   # batch axis -> megacore
        in_specs=[pl.BlockSpec((1, T + 2, cin_pad), lambda b: (b, 0, 0))]
                 + [_wspec(w) for w in weights],
        out_specs=tuple(pl.BlockSpec((1, s.shape[1], s.shape[2]),
                                     lambda b: (b, 0, 0)) for s in out_shapes),
        scratch_shapes=[pltpu.VMEM((_rows(T), c1), jnp.float32),
                        pltpu.VMEM((_rows(T2), c1), jnp.float32),
                        pltpu.VMEM((_rows(T4), c2), jnp.float32),
                        pltpu.VMEM((_rows(T8), c3), jnp.float32)],
        compiler_params=pltpu.CompilerParams(
            dimension_semantics=("parallel",)),
    )(x_prep, *weights)

    # PyTorch interface is NCT; drop these transposes if the consumer takes NTC.
    to_nct = lambda a: jnp.transpose(a, (0, 2, 1))
    return to_nct(pre), {1: to_nct(out1), 2: to_nct(out2),
                         3: to_nct(out3), 4: to_nct(out4)}


# ----------------------------------------------------------------------------
# Deterministic parameter init (synthetic, no checkpoint load)
# ----------------------------------------------------------------------------
def _init_cnr(key, cin, cout, k, residual_conv):
    ks = jax.random.split(key, 8)
    fan = math.sqrt(cin * k)
    p = {
        'w': jax.random.normal(ks[0], (k, cin, cout), jnp.float32) / fan,
        'b': 0.05 * jax.random.normal(ks[1], (cout,), jnp.float32),
        'gamma': 1.0 + 0.1 * jax.random.normal(ks[2], (cout,), jnp.float32),
        'beta': 0.1 * jax.random.normal(ks[3], (cout,), jnp.float32),
        'mean': 0.1 * jax.random.normal(ks[4], (cout,), jnp.float32),
        'var': 0.9 + 0.1 * jnp.abs(jax.random.normal(ks[5], (cout,), jnp.float32)),
    }
    if residual_conv:
        p['res_w'] = jax.random.normal(ks[6], (k, cin, cout), jnp.float32) / fan
        p['res_b'] = 0.05 * jax.random.normal(ks[7], (cout,), jnp.float32)
    return p


def init_encoder_params(key, in_dim, embedding_dim, num_hiddens, num_residual_layers):
    h4, h2, h = num_hiddens // 4, num_hiddens // 2, num_hiddens
    keys = iter(jax.random.split(key, 64))
    return {
        'project': _init_cnr(next(keys), in_dim, h4, 3, False),
        'enc_1': [_init_cnr(next(keys), h4, h4, 3, False)
                  for _ in range(num_residual_layers)],
        'down_1': _init_cnr(next(keys), h4, h4, 4, True),
        'enc_2': [_init_cnr(next(keys), h4, h4, 3, False)
                  for _ in range(num_residual_layers)],
        'down_2': _init_cnr(next(keys), h4, h2, 4, True),
        'enc_3': [_init_cnr(next(keys), h2, h2, 3, False)
                  for _ in range(num_residual_layers)],
        'down_3': _init_cnr(next(keys), h2, h, 4, True),
        'enc_4': [_init_cnr(next(keys), h, h, 3, False)
                  for _ in range(num_residual_layers)],
        'pre_vq': {
            'w': jax.random.normal(next(keys), (1, h, embedding_dim),
                                   jnp.float32) / math.sqrt(h),
            'b': 0.05 * jax.random.normal(next(keys), (embedding_dim,),
                                          jnp.float32),
        },
    }


# ----------------------------------------------------------------------------
# Plain-JAX (XLA) reference of the same module, for a numerical check
# ----------------------------------------------------------------------------
def _ref_cnr(x, p, *, sample='none', residual=False):
    stride = 2 if sample == 'down' else 1

    def conv(inp, w, b):
        y = jax.lax.conv_general_dilated(
            inp, w, window_strides=(stride,), padding=[(1, 1)],
            dimension_numbers=('NWC', 'WIO', 'NWC'))
        return y + b

    s = p['gamma'] / jnp.sqrt(p['var'] + _BN_EPS)
    y = (conv(x, p['w'], p['b']) - p['mean']) * s + p['beta']
    if residual:
        y = y + (conv(x, p['res_w'], p['res_b']) if 'res_w' in p else x)
    return jnp.where(y > 0, y, _SLOPE * y)


def _ref_forward(params, x_nct):
    x = jnp.transpose(x_nct, (0, 2, 1))
    h = _ref_cnr(x, params['project'])
    for p in params['enc_1']:
        h = _ref_cnr(h, p, residual=True)
    out1 = h
    h = _ref_cnr(h, params['down_1'], sample='down', residual=True)
    for p in params['enc_2']:
        h = _ref_cnr(h, p, residual=True)
    out2 = h
    h = _ref_cnr(h, params['down_2'], sample='down', residual=True)
    for p in params['enc_3']:
        h = _ref_cnr(h, p, residual=True)
    out3 = h
    h = _ref_cnr(h, params['down_3'], sample='down', residual=True)
    for p in params['enc_4']:
        h = _ref_cnr(h, p, residual=True)
    out4 = h
    h = jnp.einsum('btc,ce->bte', h, params['pre_vq']['w'][0]) + params['pre_vq']['b']
    t = lambda a: jnp.transpose(a, (0, 2, 1))
    return t(h), {1: t(out1), 2: t(out2), 3: t(out3), 4: t(out4)}


if __name__ == "__main__":
    # Small shapes consistent with the module: in_dim=6, num_hiddens=32
    # (=> 8/8/16/32 channels across stages), embedding_dim=16, T=32.
    B, in_dim, T = 2, 6, 32
    embedding_dim, num_hiddens = 16, 32
    num_residual_layers, num_residual_hiddens = 2, 16  # latter unused (as in PyTorch)

    key = jax.random.PRNGKey(0)
    kp, kx = jax.random.split(key)
    params = init_encoder_params(kp, in_dim, embedding_dim, num_hiddens,
                                 num_residual_layers)
    x = jax.random.normal(kx, (B, in_dim, T), jnp.float32)

    h, out = jax.jit(encoder_sc_forward)(params, x)
    jax.block_until_ready(h)
    for v in out.values():
        jax.block_until_ready(v)

    assert h.shape == (B, embedding_dim, T // 8), h.shape
    assert out[1].shape == (B, num_hiddens // 4, T)
    assert out[2].shape == (B, num_hiddens // 4, T // 2)
    assert out[3].shape == (B, num_hiddens // 2, T // 4)
    assert out[4].shape == (B, num_hiddens, T // 8)

    # Numerical check against the plain-JAX reference of the same module.
    h_ref, out_ref = jax.jit(_ref_forward)(params, x)
    err = float(jnp.max(jnp.abs(h - h_ref)))
    for i in (1, 2, 3, 4):
        err = max(err, float(jnp.max(jnp.abs(out[i] - out_ref[i]))))
    assert err < 2e-3, f"max abs error vs reference: {err}"

    print("KERNEL_OK")
</pallas_src>

<mosaic_0001>
module attributes {stable_mosaic.version = 11 : i64} {
  func.func @_encoder_kernel(%arg0: i32, %arg1: memref<1x34x8xf32, #tpu.memory_space<vmem>>, %arg2: memref<24x8xf32, #tpu.memory_space<vmem>>, %arg3: memref<1x8xf32, #tpu.memory_space<vmem>>, %arg4: memref<2x24x8xf32, #tpu.memory_space<vmem>>, %arg5: memref<2x1x8xf32, #tpu.memory_space<vmem>>, %arg6: memref<32x8xf32, #tpu.memory_space<vmem>>, %arg7: memref<1x8xf32, #tpu.memory_space<vmem>>, %arg8: memref<2x24x8xf32, #tpu.memory_space<vmem>>, %arg9: memref<2x1x8xf32, #tpu.memory_space<vmem>>, %arg10: memref<32x16xf32, #tpu.memory_space<vmem>>, %arg11: memref<1x16xf32, #tpu.memory_space<vmem>>, %arg12: memref<2x48x16xf32, #tpu.memory_space<vmem>>, %arg13: memref<2x1x16xf32, #tpu.memory_space<vmem>>, %arg14: memref<64x32xf32, #tpu.memory_space<vmem>>, %arg15: memref<1x32xf32, #tpu.memory_space<vmem>>, %arg16: memref<2x96x32xf32, #tpu.memory_space<vmem>>, %arg17: memref<2x1x32xf32, #tpu.memory_space<vmem>>, %arg18: memref<32x16xf32, #tpu.memory_space<vmem>>, %arg19: memref<1x16xf32, #tpu.memory_space<vmem>>, %arg20: memref<1x32x8xf32, #tpu.memory_space<vmem>>, %arg21: memref<1x16x8xf32, #tpu.memory_space<vmem>>, %arg22: memref<1x8x16xf32, #tpu.memory_space<vmem>>, %arg23: memref<1x4x32xf32, #tpu.memory_space<vmem>>, %arg24: memref<1x4x16xf32, #tpu.memory_space<vmem>>, %arg25: memref<48x8xf32, #tpu.memory_space<vmem>>, %arg26: memref<32x8xf32, #tpu.memory_space<vmem>>, %arg27: memref<24x16xf32, #tpu.memory_space<vmem>>, %arg28: memref<16x32xf32, #tpu.memory_space<vmem>>) attributes {dimension_semantics = [#tpu.dimension_semantics<parallel>], iteration_bounds = array<i64: 2>, scalar_prefetch = 0 : i64, scratch_operands = 4 : i64, tpu.core_type = #tpu.core_type<tc>, window_params = [{transform_indices = @transform_0, window_bounds = array<i64: 1, 34, 8>}, {pipeline_mode = #tpu.pipeline_mode<synchronous>, transform_indices = @transform_1, window_bounds = array<i64: 24, 8>}, {pipeline_mode = #tpu.pipeline_mode<synchronous>, transform_indices = @transform_2, window_bounds = array<i64: 1, 8>}, {pipeline_mode = #tpu.pipeline_mode<synchronous>, transform_indices = @transform_3, window_bounds = array<i64: 2, 24, 8>}, {pipeline_mode = #tpu.pipeline_mode<synchronous>, transform_indices = @transform_4, window_bounds = array<i64: 2, 1, 8>}, {pipeline_mode = #tpu.pipeline_mode<synchronous>, transform_indices = @transform_5, window_bounds = array<i64: 32, 8>}, {pipeline_mode = #tpu.pipeline_mode<synchronous>, transform_indices = @transform_6, window_bounds = array<i64: 1, 8>}, {pipeline_mode = #tpu.pipeline_mode<synchronous>, transform_indices = @transform_7, window_bounds = array<i64: 2, 24, 8>}, {pipeline_mode = #tpu.pipeline_mode<synchronous>, transform_indices = @transform_8, window_bounds = array<i64: 2, 1, 8>}, {pipeline_mode = #tpu.pipeline_mode<synchronous>, transform_indices = @transform_9, window_bounds = array<i64: 32, 16>}, {pipeline_mode = #tpu.pipeline_mode<synchronous>, transform_indices = @transform_10, window_bounds = array<i64: 1, 16>}, {pipeline_mode = #tpu.pipeline_mode<synchronous>, transform_indices = @transform_11, window_bounds = array<i64: 2, 48, 16>}, {pipeline_mode = #tpu.pipeline_mode<synchronous>, transform_indices = @transform_12, window_bounds = array<i64: 2, 1, 16>}, {pipeline_mode = #tpu.pipeline_mode<synchronous>, transform_indices = @transform_13, window_bounds = array<i64: 64, 32>}, {pipeline_mode = #tpu.pipeline_mode<synchronous>, transform_indices = @transform_14, window_bounds = array<i64: 1, 32>}, {pipeline_mode = #tpu.pipeline_mode<synchronous>, transform_indices = @transform_15, window_bounds = array<i64: 2, 96, 32>}, {pipeline_mode = #tpu.pipeline_mode<synchronous>, transform_indices = @transform_16, window_bounds = array<i64: 2, 1, 32>}, {pipeline_mode = #tpu.pipeline_mode<synchronous>, transform_indices = @transform_17, window_bounds = array<i64: 32, 16>}, {pipeline_mode = #tpu.pipeline_mode<synchronous>, transform_indices = @transform_18, window_bounds = array<i64: 1, 16>}, {transform_indices = @transform_19, window_bounds = array<i64: 1, 32, 8>}, {transform_indices = @transform_20, window_bounds = array<i64: 1, 16, 8>}, {transform_indices = @transform_21, window_bounds = array<i64: 1, 8, 16>}, {transform_indices = @transform_22, window_bounds = array<i64: 1, 4, 32>}, {transform_indices = @transform_23, window_bounds = array<i64: 1, 4, 16>}]} {
    %cst = arith.constant 0.000000e+00 : f32
    %0 = vector.broadcast %cst : f32 to vector<8x8xf32>
    %c0 = arith.constant 0 : index
    %c0_0 = arith.constant 0 : index
    %1 = vector.load %arg25[%c0, %c0_0] : memref<48x8xf32, #tpu.memory_space<vmem>>, vector<8x8xf32>
    tpu.vector_store %arg25[%c0, %c0_0], %0 {strides = array<i32>} : memref<48x8xf32, #tpu.memory_space<vmem>>, vector<8x8xf32>,
    %cst_1 = arith.constant 0.000000e+00 : f32
    %2 = vector.broadcast %cst_1 : f32 to vector<8x8xf32>
    %c40 = arith.constant 40 : index
    %c0_2 = arith.constant 0 : index
    %3 = vector.load %arg25[%c40, %c0_2] : memref<48x8xf32, #tpu.memory_space<vmem>>, vector<8x8xf32>
    tpu.vector_store %arg25[%c40, %c0_2], %2 {strides = array<i32>} : memref<48x8xf32, #tpu.memory_space<vmem>>, vector<8x8xf32>,
    %c0_3 = arith.constant 0 : index
    %c0_4 = arith.constant 0 : index
    %c0_5 = arith.constant 0 : index
    %4 = vector.load %arg1[%c0_3, %c0_4, %c0_5] : memref<1x34x8xf32, #tpu.memory_space<vmem>>, vector<1x32x8xf32>
    %5 = vector.shape_cast %4 : vector<1x32x8xf32> to vector<32x8xf32>
    %c0_6 = arith.constant 0 : index
    %c1 = arith.constant 1 : index
    %c0_7 = arith.constant 0 : index
    %6 = vector.load %arg1[%c0_6, %c1, %c0_7] : memref<1x34x8xf32, #tpu.memory_space<vmem>>, vector<1x32x8xf32>
    %7 = vector.shape_cast %6 : vector<1x32x8xf32> to vector<32x8xf32>
    %c0_8 = arith.constant 0 : index
    %c2 = arith.constant 2 : index
    %c0_9 = arith.constant 0 : index
    %8 = vector.load %arg1[%c0_8, %c2, %c0_9] : memref<1x34x8xf32, #tpu.memory_space<vmem>>, vector<1x32x8xf32>
    %9 = vector.shape_cast %8 : vector<1x32x8xf32> to vector<32x8xf32>
    %10 = tpu.concatenate %5, %7, %9 in 1 : vector<32x8xf32>, vector<32x8xf32>, vector<32x8xf32> -> vector<32x24xf32>
    %c0_10 = arith.constant 0 : index
    %c0_11 = arith.constant 0 : index
    %11 = vector.load %arg2[%c0_10, %c0_11] : memref<24x8xf32, #tpu.memory_space<vmem>>, vector<24x8xf32>
    %cst_12 = arith.constant dense<0.000000e+00> : vector<32x8xf32>
    %12 = tpu.matmul %10, %11, %cst_12 {dimension_numbers = #tpu.dot_dimension_numbers<[1], [0], [0], [1], [0, 0, 1, 1], [], []>} : vector<32x24xf32>, vector<24x8xf32>, vector<32x8xf32> -> vector<32x8xf32>
    %c0_13 = arith.constant 0 : index
    %c0_14 = arith.constant 0 : index
    %13 = vector.load %arg3[%c0_13, %c0_14] : memref<1x8xf32, #tpu.memory_space<vmem>>, vector<1x8xf32>
    %14 = vector.broadcast %13 : vector<1x8xf32> to vector<32x8xf32>
    %15 = arith.addf %12, %14 : vector<32x8xf32>
    %cst_15 = arith.constant 0.000000e+00 : f32
    %16 = vector.broadcast %cst_15 : f32 to vector<32x8xf32>
    %17 = arith.cmpf ogt, %15, %16 : vector<32x8xf32>
    %cst_16 = arith.constant 2.000000e-01 : f32
    %18 = vector.broadcast %cst_16 : f32 to vector<32x8xf32>
    %19 = arith.mulf %18, %15 : vector<32x8xf32>
    %20 = arith.select %17, %15, %19 : vector<32x8xi1>, vector<32x8xf32>
    %c8 = arith.constant 8 : index
    %c0_17 = arith.constant 0 : index
    %21 = vector.load %arg25[%c8, %c0_17] : memref<48x8xf32, #tpu.memory_space<vmem>>, vector<32x8xf32>
    tpu.vector_store %arg25[%c8, %c0_17], %20 {strides = array<i32>} : memref<48x8xf32, #tpu.memory_space<vmem>>, vector<32x8xf32>,
    %c8_18 = arith.constant 8 : index
    %c0_19 = arith.constant 0 : index
    %22 = vector.load %arg25[%c8_18, %c0_19] : memref<48x8xf32, #tpu.memory_space<vmem>>, vector<32x8xf32>
    %c7 = arith.constant 7 : index
    %c0_20 = arith.constant 0 : index
    %23 = vector.load %arg25[%c7, %c0_20] : memref<48x8xf32, #tpu.memory_space<vmem>>, vector<32x8xf32>
    %c9 = arith.constant 9 : index
    %c0_21 = arith.constant 0 : index
    %24 = vector.load %arg25[%c9, %c0_21] : memref<48x8xf32, #tpu.memory_space<vmem>>, vector<32x8xf32>
    %25 = tpu.concatenate %23, %22, %24 in 1 : vector<32x8xf32>, vector<32x8xf32>, vector<32x8xf32> -> vector<32x24xf32>
    %c0_22 = arith.constant 0 : index
    %c0_23 = arith.constant 0 : index
    %c0_24 = arith.constant 0 : index
    %26 = vector.load %arg4[%c0_22, %c0_23, %c0_24] : memref<2x24x8xf32, #tpu.memory_space<vmem>>, vector<1x24x8xf32>
    %27 = vector.shape_cast %26 : vector<1x24x8xf32> to vector<24x8xf32>
    %cst_25 = arith.constant dense<0.000000e+00> : vector<32x8xf32>
    %28 = tpu.matmul %25, %27, %cst_25 {dimension_numbers = #tpu.dot_dimension_numbers<[1], [0], [0], [1], [0, 0, 1, 1], [], []>} : vector<32x24xf32>, vector<24x8xf32>, vector<32x8xf32> -> vector<32x8xf32>
    %c0_26 = arith.constant 0 : index
    %c0_27 = arith.constant 0 : index
    %c0_28 = arith.constant 0 : index
    %29 = vector.load %arg5[%c0_26, %c0_27, %c0_28] : memref<2x1x8xf32, #tpu.memory_space<vmem>>, vector<1x1x8xf32>
    %30 = vector.shape_cast %29 : vector<1x1x8xf32> to vector<1x8xf32>
    %31 = vector.broadcast %30 : vector<1x8xf32> to vector<32x8xf32>
    %32 = arith.addf %28, %31 : vector<32x8xf32>
    %33 = arith.addf %32, %22 : vector<32x8xf32>
    %cst_29 = arith.constant 0.000000e+00 : f32
    %34 = vector.broadcast %cst_29 : f32 to vector<32x8xf32>
    %35 = arith.cmpf ogt, %33, %34 : vector<32x8xf32>
    %cst_30 = arith.constant 2.000000e-01 : f32
    %36 = vector.broadcast %cst_30 : f32 to vector<32x8xf32>
    %37 = arith.mulf %36, %33 : vector<32x8xf32>
    %38 = arith.select %35, %33, %37 : vector<32x8xi1>, vector<32x8xf32>
    %c8_31 = arith.constant 8 : index
    %c0_32 = arith.constant 0 : index
    %39 = vector.load %arg25[%c8_31, %c0_32] : memref<48x8xf32, #tpu.memory_space<vmem>>, vector<32x8xf32>
    tpu.vector_store %arg25[%c8_31, %c0_32], %38 {strides = array<i32>} : memref<48x8xf32, #tpu.memory_space<vmem>>, vector<32x8xf32>,
    %c7_33 = arith.constant 7 : index
    %c0_34 = arith.constant 0 : index
    %40 = vector.load %arg25[%c7_33, %c0_34] : memref<48x8xf32, #tpu.memory_space<vmem>>, vector<32x8xf32>
    %c9_35 = arith.constant 9 : index
    %c0_36 = arith.constant 0 : index
    %41 = vector.load %arg25[%c9_35, %c0_36] : memref<48x8xf32, #tpu.memory_space<vmem>>, vector<32x8xf32>
    %42 = tpu.concatenate %40, %38, %41 in 1 : vector<32x8xf32>, vector<32x8xf32>, vector<32x8xf32> -> vector<32x24xf32>
    %c1_37 = arith.constant 1 : index
    %c0_38 = arith.constant 0 : index
    %c0_39 = arith.constant 0 : index
    %43 = vector.load %arg4[%c1_37, %c0_38, %c0_39] : memref<2x24x8xf32, #tpu.memory_space<vmem>>, vector<1x24x8xf32>
    %44 = vector.shape_cast %43 : vector<1x24x8xf32> to vector<24x8xf32>
    %cst_40 = arith.constant dense<0.000000e+00> : vector<32x8xf32>
    %45 = tpu.matmul %42, %44, %cst_40 {dimension_numbers = #tpu.dot_dimension_numbers<[1], [0], [0], [1], [0, 0, 1, 1], [], []>} : vector<32x24xf32>, vector<24x8xf32>, vector<32x8xf32> -> vector<32x8xf32>
    %c1_41 = arith.constant 1 : index
    %c0_42 = arith.constant 0 : index
    %c0_43 = arith.constant 0 : index
    %46 = vector.load %arg5[%c1_41, %c0_42, %c0_43] : memref<2x1x8xf32, #tpu.memory_space<vmem>>, vector<1x1x8xf32>
    %47 = vector.shape_cast %46 : vector<1x1x8xf32> to vector<1x8xf32>
    %48 = vector.broadcast %47 : vector<1x8xf32> to vector<32x8xf32>
    %49 = arith.addf %45, %48 : vector<32x8xf32>
    %50 = arith.addf %49, %38 : vector<32x8xf32>
    %cst_44 = arith.constant 0.000000e+00 : f32
    %51 = vector.broadcast %cst_44 : f32 to vector<32x8xf32>
    %52 = arith.cmpf ogt, %50, %51 : vector<32x8xf32>
    %cst_45 = arith.constant 2.000000e-01 : f32
    %53 = vector.broadcast %cst_45 : f32 to vector<32x8xf32>
    %54 = arith.mulf %53, %50 : vector<32x8xf32>
    %55 = arith.select %52, %50, %54 : vector<32x8xi1>, vector<32x8xf32>
    %c8_46 = arith.constant 8 : index
    %c0_47 = arith.constant 0 : index
    %56 = vector.load %arg25[%c8_46, %c0_47] : memref<48x8xf32, #tpu.memory_space<vmem>>, vector<32x8xf32>
    tpu.vector_store %arg25[%c8_46, %c0_47], %55 {strides = array<i32>} : memref<48x8xf32, #tpu.memory_space<vmem>>, vector<32x8xf32>,
    %c0_48 = arith.constant 0 : index
    %c0_49 = arith.constant 0 : index
    %c0_50 = arith.constant 0 : index
    %57 = vector.load %arg20[%c0_48, %c0_49, %c0_50] : memref<1x32x8xf32, #tpu.memory_space<vmem>>, vector<1x32x8xf32>
    %58 = vector.shape_cast %57 : vector<1x32x8xf32> to vector<32x8xf32>
    %59 = vector.shape_cast %55 : vector<32x8xf32> to vector<1x32x8xf32>
    tpu.vector_store %arg20[%c0_48, %c0_49, %c0_50], %59 {strides = array<i32>} : memref<1x32x8xf32, #tpu.memory_space<vmem>>, vector<1x32x8xf32>,
    %c7_51 = arith.constant 7 : index
    %c0_52 = arith.constant 0 : index
    %60 = vector.load %arg25[%c7_51, %c0_52] : memref<48x8xf32, #tpu.memory_space<vmem>>, vector<34x8xf32>
    %61 = tpu.iota {dimensions = array<i32: 0>} : vector<16x34xi32>
    %62 = tpu.iota {dimensions = array<i32: 1>} : vector<16x34xi32>
    %c2_i32 = arith.constant 2 : i32
    %63 = vector.broadcast %c2_i32 : i32 to vector<16x34xi32>
    %64 = arith.muli %63, %61 : vector<16x34xi32>
    %c0_i32 = arith.constant 0 : i32
    %65 = vector.broadcast %c0_i32 : i32 to vector<16x34xi32>
    %66 = arith.addi %64, %65 : vector<16x34xi32>
    %67 = arith.cmpi eq, %62, %66 : vector<16x34xi32>
    %68 = arith.extui %67 : vector<16x34xi1> to vector<16x34xi32>
    %69 = arith.sitofp %68 : vector<16x34xi32> to vector<16x34xf32>
    %cst_53 = arith.constant dense<0.000000e+00> : vector<16x8xf32>
    %70 = tpu.matmul %69, %60, %cst_53 {dimension_numbers = #tpu.dot_dimension_numbers<[1], [0], [0], [1], [0, 0, 1, 1], [], []>} : vector<16x34xf32>, vector<34x8xf32>, vector<16x8xf32> -> vector<16x8xf32>
    %c2_i32_54 = arith.constant 2 : i32
    %71 = vector.broadcast %c2_i32_54 : i32 to vector<16x34xi32>
    %72 = arith.muli %71, %61 : vector<16x34xi32>
    %c1_i32 = arith.constant 1 : i32
    %73 = vector.broadcast %c1_i32 : i32 to vector<16x34xi32>
    %74 = arith.addi %72, %73 : vector<16x34xi32>
    %75 = arith.cmpi eq, %62, %74 : vector<16x34xi32>
    %76 = arith.extui %75 : vector<16x34xi1> to vector<16x34xi32>
    %77 = arith.sitofp %76 : vector<16x34xi32> to vector<16x34xf32>
    %cst_55 = arith.constant dense<0.000000e+00> : vector<16x8xf32>
    %78 = tpu.matmul %77, %60, %cst_55 {dimension_numbers = #tpu.dot_dimension_numbers<[1], [0], [0], [1], [0, 0, 1, 1], [], []>} : vector<16x34xf32>, vector<34x8xf32>, vector<16x8xf32> -> vector<16x8xf32>
    %c2_i32_56 = arith.constant 2 : i32
    %79 = vector.broadcast %c2_i32_56 : i32 to vector<16x34xi32>
    %80 = arith.muli %79, %61 : vector<16x34xi32>
    %c2_i32_57 = arith.constant 2 : i32
    %81 = vector.broadcast %c2_i32_57 : i32 to vector<16x34xi32>
    %82 = arith.addi %80, %81 : vector<16x34xi32>
    %83 = arith.cmpi eq, %62, %82 : vector<16x34xi32>
    %84 = arith.extui %83 : vector<16x34xi1> to vector<16x34xi32>
    %85 = arith.sitofp %84 : vector<16x34xi32> to vector<16x34xf32>
    %cst_58 = arith.constant dense<0.000000e+00> : vector<16x8xf32>
    %86 = tpu.matmul %85, %60, %cst_58 {dimension_numbers = #tpu.dot_dimension_numbers<[1], [0], [0], [1], [0, 0, 1, 1], [], []>} : vector<16x34xf32>, vector<34x8xf32>, vector<16x8xf32> -> vector<16x8xf32>
    %c2_i32_59 = arith.constant 2 : i32
    %87 = vector.broadcast %c2_i32_59 : i32 to vector<16x34xi32>
    %88 = arith.muli %87, %61 : vector<16x34xi32>
    %c3_i32 = arith.constant 3 : i32
    %89 = vector.broadcast %c3_i32 : i32 to vector<16x34xi32>
    %90 = arith.addi %88, %89 : vector<16x34xi32>
    %91 = arith.cmpi eq, %62, %90 : vector<16x34xi32>
    %92 = arith.extui %91 : vector<16x34xi1> to vector<16x34xi32>
    %93 = arith.sitofp %92 : vector<16x34xi32> to vector<16x34xf32>
    %cst_60 = arith.constant dense<0.000000e+00> : vector<16x8xf32>
    %94 = tpu.matmul %93, %60, %cst_60 {dimension_numbers = #tpu.dot_dimension_numbers<[1], [0], [0], [1], [0, 0, 1, 1], [], []>} : vector<16x34xf32>, vector<34x8xf32>, vector<16x8xf32> -> vector<16x8xf32>
    %95 = tpu.concatenate %70, %78, %86, %94 in 1 : vector<16x8xf32>, vector<16x8xf32>, vector<16x8xf32>, vector<16x8xf32> -> vector<16x32xf32>
    %c0_61 = arith.constant 0 : index
    %c0_62 = arith.constant 0 : index
    %96 = vector.load %arg6[%c0_61, %c0_62] : memref<32x8xf32, #tpu.memory_space<vmem>>, vector<32x8xf32>
    %cst_63 = arith.constant dense<0.000000e+00> : vector<16x8xf32>
    %97 = tpu.matmul %95, %96, %cst_63 {dimension_numbers = #tpu.dot_dimension_numbers<[1], [0], [0], [1], [0, 0, 1, 1], [], []>} : vector<16x32xf32>, vector<32x8xf32>, vector<16x8xf32> -> vector<16x8xf32>
    %c0_64 = arith.constant 0 : index
    %c0_65 = arith.constant 0 : index
    %98 = vector.load %arg7[%c0_64, %c0_65] : memref<1x8xf32, #tpu.memory_space<vmem>>, vector<1x8xf32>
    %99 = vector.broadcast %98 : vector<1x8xf32> to vector<16x8xf32>
    %100 = arith.addf %97, %99 : vector<16x8xf32>
    %cst_66 = arith.constant 0.000000e+00 : f32
    %101 = vector.broadcast %cst_66 : f32 to vector<16x8xf32>
    %102 = arith.cmpf ogt, %100, %101 : vector<16x8xf32>
    %cst_67 = arith.constant 2.000000e-01 : f32
    %103 = vector.broadcast %cst_67 : f32 to vector<16x8xf32>
    %104 = arith.mulf %103, %100 : vector<16x8xf32>
    %105 = arith.select %102, %100, %104 : vector<16x8xi1>, vector<16x8xf32>
    %cst_68 = arith.constant 0.000000e+00 : f32
    %106 = vector.broadcast %cst_68 : f32 to vector<8x8xf32>
    %c0_69 = arith.constant 0 : index
    %c0_70 = arith.constant 0 : index
    %107 = vector.load %arg26[%c0_69, %c0_70] : memref<32x8xf32, #tpu.memory_space<vmem>>, vector<8x8xf32>
    tpu.vector_store %arg26[%c0_69, %c0_70], %106 {strides = array<i32>} : memref<32x8xf32, #tpu.memory_space<vmem>>, vector<8x8xf32>,
    %cst_71 = arith.constant 0.000000e+00 : f32
    %108 = vector.broadcast %cst_71 : f32 to vector<8x8xf32>
    %c24 = arith.constant 24 : index
    %c0_72 = arith.constant 0 : index
    %109 = vector.load %arg26[%c24, %c0_72] : memref<32x8xf32, #tpu.memory_space<vmem>>, vector<8x8xf32>
    tpu.vector_store %arg26[%c24, %c0_72], %108 {strides = array<i32>} : memref<32x8xf32, #tpu.memory_space<vmem>>, vector<8x8xf32>,
    %c8_73 = arith.constant 8 : index
    %c0_74 = arith.constant 0 : index
    %110 = vector.load %arg26[%c8_73, %c0_74] : memref<32x8xf32, #tpu.memory_space<vmem>>, vector<16x8xf32>
    tpu.vector_store %arg26[%c8_73, %c0_74], %105 {strides = array<i32>} : memref<32x8xf32, #tpu.memory_space<vmem>>, vector<16x8xf32>,
    %c8_75 = arith.constant 8 : index
    %c0_76 = arith.constant 0 : index
    %111 = vector.load %arg26[%c8_75, %c0_76] : memref<32x8xf32, #tpu.memory_space<vmem>>, vector<16x8xf32>
    %c7_77 = arith.constant 7 : index
    %c0_78 = arith.constant 0 : index
    %112 = vector.load %arg26[%c7_77, %c0_78] : memref<32x8xf32, #tpu.memory_space<vmem>>, vector<16x8xf32>
    %c9_79 = arith.constant 9 : index
    %c0_80 = arith.constant 0 : index
    %113 = vector.load %arg26[%c9_79, %c0_80] : memref<32x8xf32, #tpu.memory_space<vmem>>, vector<16x8xf32>
    %114 = tpu.concatenate %112, %111, %113 in 1 : vector<16x8xf32>, vector<16x8xf32>, vector<16x8xf32> -> vector<16x24xf32>
    %c0_81 = arith.constant 0 : index
    %c0_82 = arith.constant 0 : index
    %c0_83 = arith.constant 0 : index
    %115 = vector.load %arg8[%c0_81, %c0_82, %c0_83] : memref<2x24x8xf32, #tpu.memory_space<vmem>>, vector<1x24x8xf32>
    %116 = vector.shape_cast %115 : vector<1x24x8xf32> to vector<24x8xf32>
    %cst_84 = arith.constant dense<0.000000e+00> : vector<16x8xf32>
    %117 = tpu.matmul %114, %116, %cst_84 {dimension_numbers = #tpu.dot_dimension_numbers<[1], [0], [0], [1], [0, 0, 1, 1], [], []>} : vector<16x24xf32>, vector<24x8xf32>, vector<16x8xf32> -> vector<16x8xf32>
    %c0_85 = arith.constant 0 : index
    %c0_86 = arith.constant 0 : index
    %c0_87 = arith.constant 0 : index
    %118 = vector.load %arg9[%c0_85, %c0_86, %c0_87] : memref<2x1x8xf32, #tpu.memory_space<vmem>>, vector<1x1x8xf32>
    %119 = vector.shape_cast %118 : vector<1x1x8xf32> to vector<1x8xf32>
    %120 = vector.broadcast %119 : vector<1x8xf32> to vector<16x8xf32>
    %121 = arith.addf %117, %120 : vector<16x8xf32>
    %122 = arith.addf %121, %111 : vector<16x8xf32>
    %cst_88 = arith.constant 0.000000e+00 : f32
    %123 = vector.broadcast %cst_88 : f32 to vector<16x8xf32>
    %124 = arith.cmpf ogt, %122, %123 : vector<16x8xf32>
    %cst_89 = arith.constant 2.000000e-01 : f32
    %125 = vector.broadcast %cst_89 : f32 to vector<16x8xf32>
    %126 = arith.mulf %125, %122 : vector<16x8xf32>
    %127 = arith.select %124, %122, %126 : vector<16x8xi1>, vector<16x8xf32>
    %c8_90 = arith.constant 8 : index
    %c0_91 = arith.constant 0 : index
    %128 = vector.load %arg26[%c8_90, %c0_91] : memref<32x8xf32, #tpu.memory_space<vmem>>, vector<16x8xf32>
    tpu.vector_store %arg26[%c8_90, %c0_91], %127 {strides = array<i32>} : memref<32x8xf32, #tpu.memory_space<vmem>>, vector<16x8xf32>,
    %c7_92 = arith.constant 7 : index
    %c0_93 = arith.constant 0 : index
    %129 = vector.load %arg26[%c7_92, %c0_93] : memref<32x8xf32, #tpu.memory_space<vmem>>, vector<16x8xf32>
    %c9_94 = arith.constant 9 : index
    %c0_95 = arith.constant 0 : index
    %130 = vector.load %arg26[%c9_94, %c0_95] : memref<32x8xf32, #tpu.memory_space<vmem>>, vector<16x8xf32>
    %131 = tpu.concatenate %129, %127, %130 in 1 : vector<16x8xf32>, vector<16x8xf32>, vector<16x8xf32> -> vector<16x24xf32>
    %c1_96 = arith.constant 1 : index
    %c0_97 = arith.constant 0 : index
    %c0_98 = arith.constant 0 : index
    %132 = vector.load %arg8[%c1_96, %c0_97, %c0_98] : memref<2x24x8xf32, #tpu.memory_space<vmem>>, vector<1x24x8xf32>
    %133 = vector.shape_cast %132 : vector<1x24x8xf32> to vector<24x8xf32>
    %cst_99 = arith.constant dense<0.000000e+00> : vector<16x8xf32>
    %134 = tpu.matmul %131, %133, %cst_99 {dimension_numbers = #tpu.dot_dimension_numbers<[1], [0], [0], [1], [0, 0, 1, 1], [], []>} : vector<16x24xf32>, vector<24x8xf32>, vector<16x8xf32> -> vector<16x8xf32>
    %c1_100 = arith.constant 1 : index
    %c0_101 = arith.constant 0 : index
    %c0_102 = arith.constant 0 : index
    %135 = vector.load %arg9[%c1_100, %c0_101, %c0_102] : memref<2x1x8xf32, #tpu.memory_space<vmem>>, vector<1x1x8xf32>
    %136 = vector.shape_cast %135 : vector<1x1x8xf32> to vector<1x8xf32>
    %137 = vector.broadcast %136 : vector<1x8xf32> to vector<16x8xf32>
    %138 = arith.addf %134, %137 : vector<16x8xf32>
    %139 = arith.addf %138, %127 : vector<16x8xf32>
    %cst_103 = arith.constant 0.000000e+00 : f32
    %140 = vector.broadcast %cst_103 : f32 to vector<16x8xf32>
    %141 = arith.cmpf ogt, %139, %140 : vector<16x8xf32>
    %cst_104 = arith.constant 2.000000e-01 : f32
    %142 = vector.broadcast %cst_104 : f32 to vector<16x8xf32>
    %143 = arith.mulf %142, %139 : vector<16x8xf32>
    %144 = arith.select %141, %139, %143 : vector<16x8xi1>, vector<16x8xf32>
    %c8_105 = arith.constant 8 : index
    %c0_106 = arith.constant 0 : index
    %145 = vector.load %arg26[%c8_105, %c0_106] : memref<32x8xf32, #tpu.memory_space<vmem>>, vector<16x8xf32>
    tpu.vector_store %arg26[%c8_105, %c0_106], %144 {strides = array<i32>} : memref<32x8xf32, #tpu.memory_space<vmem>>, vector<16x8xf32>,
    %c0_107 = arith.constant 0 : index
    %c0_108 = arith.constant 0 : index
    %c0_109 = arith.constant 0 : index
    %146 = vector.load %arg21[%c0_107, %c0_108, %c0_109] : memref<1x16x8xf32, #tpu.memory_space<vmem>>, vector<1x16x8xf32>
    %147 = vector.shape_cast %146 : vector<1x16x8xf32> to vector<16x8xf32>
    %148 = vector.shape_cast %144 : vector<16x8xf32> to vector<1x16x8xf32>
    tpu.vector_store %arg21[%c0_107, %c0_108, %c0_109], %148 {strides = array<i32>} : memref<1x16x8xf32, #tpu.memory_space<vmem>>, vector<1x16x8xf32>,
    %c7_110 = arith.constant 7 : index
    %c0_111 = arith.constant 0 : index
    %149 = vector.load %arg26[%c7_110, %c0_111] : memref<32x8xf32, #tpu.memory_space<vmem>>, vector<18x8xf32>
    %150 = tpu.iota {dimensions = array<i32: 0>} : vector<8x18xi32>
    %151 = tpu.iota {dimensions = array<i32: 1>} : vector<8x18xi32>
    %c2_i32_112 = arith.constant 2 : i32
    %152 = vector.broadcast %c2_i32_112 : i32 to vector<8x18xi32>
    %153 = arith.muli %152, %150 : vector<8x18xi32>
    %c0_i32_113 = arith.constant 0 : i32
    %154 = vector.broadcast %c0_i32_113 : i32 to vector<8x18xi32>
    %155 = arith.addi %153, %154 : vector<8x18xi32>
    %156 = arith.cmpi eq, %151, %155 : vector<8x18xi32>
    %157 = arith.extui %156 : vector<8x18xi1> to vector<8x18xi32>
    %158 = arith.sitofp %157 : vector<8x18xi32> to vector<8x18xf32>
    %cst_114 = arith.constant dense<0.000000e+00> : vector<8x8xf32>
    %159 = tpu.matmul %158, %149, %cst_114 {dimension_numbers = #tpu.dot_dimension_numbers<[1], [0], [0], [1], [0, 0, 1, 1], [], []>} : vector<8x18xf32>, vector<18x8xf32>, vector<8x8xf32> -> vector<8x8xf32>
    %c2_i32_115 = arith.constant 2 : i32
    %160 = vector.broadcast %c2_i32_115 : i32 to vector<8x18xi32>
    %161 = arith.muli %160, %150 : vector<8x18xi32>
    %c1_i32_116 = arith.constant 1 : i32
    %162 = vector.broadcast %c1_i32_116 : i32 to vector<8x18xi32>
    %163 = arith.addi %161, %162 : vector<8x18xi32>
    %164 = arith.cmpi eq, %151, %163 : vector<8x18xi32>
    %165 = arith.extui %164 : vector<8x18xi1> to vector<8x18xi32>
    %166 = arith.sitofp %165 : vector<8x18xi32> to vector<8x18xf32>
    %cst_117 = arith.constant dense<0.000000e+00> : vector<8x8xf32>
    %167 = tpu.matmul %166, %149, %cst_117 {dimension_numbers = #tpu.dot_dimension_numbers<[1], [0], [0], [1], [0, 0, 1, 1], [], []>} : vector<8x18xf32>, vector<18x8xf32>, vector<8x8xf32> -> vector<8x8xf32>
    %c2_i32_118 = arith.constant 2 : i32
    %168 = vector.broadcast %c2_i32_118 : i32 to vector<8x18xi32>
    %169 = arith.muli %168, %150 : vector<8x18xi32>
    %c2_i32_119 = arith.constant 2 : i32
    %170 = vector.broadcast %c2_i32_119 : i32 to vector<8x18xi32>
    %171 = arith.addi %169, %170 : vector<8x18xi32>
    %172 = arith.cmpi eq, %151, %171 : vector<8x18xi32>
    %173 = arith.extui %172 : vector<8x18xi1> to vector<8x18xi32>
    %174 = arith.sitofp %173 : vector<8x18xi32> to vector<8x18xf32>
    %cst_120 = arith.constant dense<0.000000e+00> : vector<8x8xf32>
    %175 = tpu.matmul %174, %149, %cst_120 {dimension_numbers = #tpu.dot_dimension_numbers<[1], [0], [0], [1], [0, 0, 1, 1], [], []>} : vector<8x18xf32>, vector<18x8xf32>, vector<8x8xf32> -> vector<8x8xf32>
    %c2_i32_121 = arith.constant 2 : i32
    %176 = vector.broadcast %c2_i32_121 : i32 to vector<8x18xi32>
    %177 = arith.muli %176, %150 : vector<8x18xi32>
    %c3_i32_122 = arith.constant 3 : i32
    %178 = vector.broadcast %c3_i32_122 : i32 to vector<8x18xi32>
    %179 = arith.addi %177, %178 : vector<8x18xi32>
    %180 = arith.cmpi eq, %151, %179 : vector<8x18xi32>
    %181 = arith.extui %180 : vector<8x18xi1> to vector<8x18xi32>
    %182 = arith.sitofp %181 : vector<8x18xi32> to vector<8x18xf32>
    %cst_123 = arith.constant dense<0.000000e+00> : vector<8x8xf32>
    %183 = tpu.matmul %182, %149, %cst_123 {dimension_numbers = #tpu.dot_dimension_numbers<[1], [0], [0], [1], [0, 0, 1, 1], [], []>} : vector<8x18xf32>, vector<18x8xf32>, vector<8x8xf32> -> vector<8x8xf32>
    %184 = tpu.concatenate %159, %167, %175, %183 in 1 : vector<8x8xf32>, vector<8x8xf32>, vector<8x8xf32>, vector<8x8xf32> -> vector<8x32xf32>
    %c0_124 = arith.constant 0 : index
    %c0_125 = arith.constant 0 : index
    %185 = vector.load %arg10[%c0_124, %c0_125] : memref<32x16xf32, #tpu.memory_space<vmem>>, vector<32x16xf32>
    %cst_126 = arith.constant dense<0.000000e+00> : vector<8x16xf32>
    %186 = tpu.matmul %184, %185, %cst_126 {dimension_numbers = #tpu.dot_dimension_numbers<[1], [0], [0], [1], [0, 0, 1, 1], [], []>} : vector<8x32xf32>, vector<32x16xf32>, vector<8x16xf32> -> vector<8x16xf32>
    %c0_127 = arith.constant 0 : index
    %c0_128 = arith.constant 0 : index
    %187 = vector.load %arg11[%c0_127, %c0_128] : memref<1x16xf32, #tpu.memory_space<vmem>>, vector<1x16xf32>
    %188 = vector.broadcast %187 : vector<1x16xf32> to vector<8x16xf32>
    %189 = arith.addf %186, %188 : vector<8x16xf32>
    %cst_129 = arith.constant 0.000000e+00 : f32
    %190 = vector.broadcast %cst_129 : f32 to vector<8x16xf32>
    %191 = arith.cmpf ogt, %189, %190 : vector<8x16xf32>
    %cst_130 = arith.constant 2.000000e-01 : f32
    %192 = vector.broadcast %cst_130 : f32 to vector<8x16xf32>
    %193 = arith.mulf %192, %189 : vector<8x16xf32>
    %194 = arith.select %191, %189, %193 : vector<8x16xi1>, vector<8x16xf32>
    %cst_131 = arith.constant 0.000000e+00 : f32
    %195 = vector.broadcast %cst_131 : f32 to vector<8x16xf32>
    %c0_132 = arith.constant 0 : index
    %c0_133 = arith.constant 0 : index
    %196 = vector.load %arg27[%c0_132, %c0_133] : memref<24x16xf32, #tpu.memory_space<vmem>>, vector<8x16xf32>
    tpu.vector_store %arg27[%c0_132, %c0_133], %195 {strides = array<i32>} : memref<24x16xf32, #tpu.memory_space<vmem>>, vector<8x16xf32>,
    %cst_134 = arith.constant 0.000000e+00 : f32
    %197 = vector.broadcast %cst_134 : f32 to vector<8x16xf32>
    %c16 = arith.constant 16 : index
    %c0_135 = arith.constant 0 : index
    %198 = vector.load %arg27[%c16, %c0_135] : memref<24x16xf32, #tpu.memory_space<vmem>>, vector<8x16xf32>
    tpu.vector_store %arg27[%c16, %c0_135], %197 {strides = array<i32>} : memref<24x16xf32, #tpu.memory_space<vmem>>, vector<8x16xf32>,
    %c8_136 = arith.constant 8 : index
    %c0_137 = arith.constant 0 : index
    %199 = vector.load %arg27[%c8_136, %c0_137] : memref<24x16xf32, #tpu.memory_space<vmem>>, vector<8x16xf32>
    tpu.vector_store %arg27[%c8_136, %c0_137], %194 {strides = array<i32>} : memref<24x16xf32, #tpu.memory_space<vmem>>, vector<8x16xf32>,
    %c8_138 = arith.constant 8 : index
    %c0_139 = arith.constant 0 : index
    %200 = vector.load %arg27[%c8_138, %c0_139] : memref<24x16xf32, #tpu.memory_space<vmem>>, vector<8x16xf32>
    %c7_140 = arith.constant 7 : index
    %c0_141 = arith.constant 0 : index
    %201 = vector.load %arg27[%c7_140, %c0_141] : memref<24x16xf32, #tpu.memory_space<vmem>>, vector<8x16xf32>
    %c9_142 = arith.constant 9 : index
    %c0_143 = arith.constant 0 : index
    %202 = vector.load %arg27[%c9_142, %c0_143] : memref<24x16xf32, #tpu.memory_space<vmem>>, vector<8x16xf32>
    %203 = tpu.concatenate %201, %200, %202 in 1 : vector<8x16xf32>, vector<8x16xf32>, vector<8x16xf32> -> vector<8x48xf32>
    %c0_144 = arith.constant 0 : index
    %c0_145 = arith.constant 0 : index
    %c0_146 = arith.constant 0 : index
    %204 = vector.load %arg12[%c0_144, %c0_145, %c0_146] : memref<2x48x16xf32, #tpu.memory_space<vmem>>, vector<1x48x16xf32>
    %205 = vector.shape_cast %204 : vector<1x48x16xf32> to vector<48x16xf32>
    %cst_147 = arith.constant dense<0.000000e+00> : vector<8x16xf32>
    %206 = tpu.matmul %203, %205, %cst_147 {dimension_numbers = #tpu.dot_dimension_numbers<[1], [0], [0], [1], [0, 0, 1, 1], [], []>} : vector<8x48xf32>, vector<48x16xf32>, vector<8x16xf32> -> vector<8x16xf32>
    %c0_148 = arith.constant 0 : index
    %c0_149 = arith.constant 0 : index
    %c0_150 = arith.constant 0 : index
    %207 = vector.load %arg13[%c0_148, %c0_149, %c0_150] : memref<2x1x16xf32, #tpu.memory_space<vmem>>, vector<1x1x16xf32>
    %208 = vector.shape_cast %207 : vector<1x1x16xf32> to vector<1x16xf32>
    %209 = vector.broadcast %208 : vector<1x16xf32> to vector<8x16xf32>
    %210 = arith.addf %206, %209 : vector<8x16xf32>
    %211 = arith.addf %210, %200 : vector<8x16xf32>
    %cst_151 = arith.constant 0.000000e+00 : f32
    %212 = vector.broadcast %cst_151 : f32 to vector<8x16xf32>
    %213 = arith.cmpf ogt, %211, %212 : vector<8x16xf32>
    %cst_152 = arith.constant 2.000000e-01 : f32
    %214 = vector.broadcast %cst_152 : f32 to vector<8x16xf32>
    %215 = arith.mulf %214, %211 : vector<8x16xf32>
    %216 = arith.select %213, %211, %215 : vector<8x16xi1>, vector<8x16xf32>
    %c8_153 = arith.constant 8 : index
    %c0_154 = arith.constant 0 : index
    %217 = vector.load %arg27[%c8_153, %c0_154] : memref<24x16xf32, #tpu.memory_space<vmem>>, vector<8x16xf32>
    tpu.vector_store %arg27[%c8_153, %c0_154], %216 {strides = array<i32>} : memref<24x16xf32, #tpu.memory_space<vmem>>, vector<8x16xf32>,
    %c7_155 = arith.constant 7 : index
    %c0_156 = arith.constant 0 : index
    %218 = vector.load %arg27[%c7_155, %c0_156] : memref<24x16xf32, #tpu.memory_space<vmem>>, vector<8x16xf32>
    %c9_157 = arith.constant 9 : index
    %c0_158 = arith.constant 0 : index
    %219 = vector.load %arg27[%c9_157, %c0_158] : memref<24x16xf32, #tpu.memory_space<vmem>>, vector<8x16xf32>
    %220 = tpu.concatenate %218, %216, %219 in 1 : vector<8x16xf32>, vector<8x16xf32>, vector<8x16xf32> -> vector<8x48xf32>
    %c1_159 = arith.constant 1 : index
    %c0_160 = arith.constant 0 : index
    %c0_161 = arith.constant 0 : index
    %221 = vector.load %arg12[%c1_159, %c0_160, %c0_161] : memref<2x48x16xf32, #tpu.memory_space<vmem>>, vector<1x48x16xf32>
    %222 = vector.shape_cast %221 : vector<1x48x16xf32> to vector<48x16xf32>
    %cst_162 = arith.constant dense<0.000000e+00> : vector<8x16xf32>
    %223 = tpu.matmul %220, %222, %cst_162 {dimension_numbers = #tpu.dot_dimension_numbers<[1], [0], [0], [1], [0, 0, 1, 1], [], []>} : vector<8x48xf32>, vector<48x16xf32>, vector<8x16xf32> -> vector<8x16xf32>
    %c1_163 = arith.constant 1 : index
    %c0_164 = arith.constant 0 : index
    %c0_165 = arith.constant 0 : index
    %224 = vector.load %arg13[%c1_163, %c0_164, %c0_165] : memref<2x1x16xf32, #tpu.memory_space<vmem>>, vector<1x1x16xf32>
    %225 = vector.shape_cast %224 : vector<1x1x16xf32> to vector<1x16xf32>
    %226 = vector.broadcast %225 : vector<1x16xf32> to vector<8x16xf32>
    %227 = arith.addf %223, %226 : vector<8x16xf32>
    %228 = arith.addf %227, %216 : vector<8x16xf32>
    %cst_166 = arith.constant 0.000000e+00 : f32
    %229 = vector.broadcast %cst_166 : f32 to vector<8x16xf32>
    %230 = arith.cmpf ogt, %228, %229 : vector<8x16xf32>
    %cst_167 = arith.constant 2.000000e-01 : f32
    %231 = vector.broadcast %cst_167 : f32 to vector<8x16xf32>
    %232 = arith.mulf %231, %228 : vector<8x16xf32>
    %233 = arith.select %230, %228, %232 : vector<8x16xi1>, vector<8x16xf32>
    %c8_168 = arith.constant 8 : index
    %c0_169 = arith.constant 0 : index
    %234 = vector.load %arg27[%c8_168, %c0_169] : memref<24x16xf32, #tpu.memory_space<vmem>>, vector<8x16xf32>
    tpu.vector_store %arg27[%c8_168, %c0_169], %233 {strides = array<i32>} : memref<24x16xf32, #tpu.memory_space<vmem>>, vector<8x16xf32>,
    %c0_170 = arith.constant 0 : index
    %c0_171 = arith.constant 0 : index
    %c0_172 = arith.constant 0 : index
    %235 = vector.load %arg22[%c0_170, %c0_171, %c0_172] : memref<1x8x16xf32, #tpu.memory_space<vmem>>, vector<1x8x16xf32>
    %236 = vector.shape_cast %235 : vector<1x8x16xf32> to vector<8x16xf32>
    %237 = vector.shape_cast %233 : vector<8x16xf32> to vector<1x8x16xf32>
    tpu.vector_store %arg22[%c0_170, %c0_171, %c0_172], %237 {strides = array<i32>} : memref<1x8x16xf32, #tpu.memory_space<vmem>>, vector<1x8x16xf32>,
    %c7_173 = arith.constant 7 : index
    %c0_174 = arith.constant 0 : index
    %238 = vector.load %arg27[%c7_173, %c0_174] : memref<24x16xf32, #tpu.memory_space<vmem>>, vector<10x16xf32>
    %239 = tpu.iota {dimensions = array<i32: 0>} : vector<4x10xi32>
    %240 = tpu.iota {dimensions = array<i32: 1>} : vector<4x10xi32>
    %c2_i32_175 = arith.constant 2 : i32
    %241 = vector.broadcast %c2_i32_175 : i32 to vector<4x10xi32>
    %242 = arith.muli %241, %239 : vector<4x10xi32>
    %c0_i32_176 = arith.constant 0 : i32
    %243 = vector.broadcast %c0_i32_176 : i32 to vector<4x10xi32>
    %244 = arith.addi %242, %243 : vector<4x10xi32>
    %245 = arith.cmpi eq, %240, %244 : vector<4x10xi32>
    %246 = arith.extui %245 : vector<4x10xi1> to vector<4x10xi32>
    %247 = arith.sitofp %246 : vector<4x10xi32> to vector<4x10xf32>
    %cst_177 = arith.constant dense<0.000000e+00> : vector<4x16xf32>
    %248 = tpu.matmul %247, %238, %cst_177 {dimension_numbers = #tpu.dot_dimension_numbers<[1], [0], [0], [1], [0, 0, 1, 1], [], []>} : vector<4x10xf32>, vector<10x16xf32>, vector<4x16xf32> -> vector<4x16xf32>
    %c2_i32_178 = arith.constant 2 : i32
    %249 = vector.broadcast %c2_i32_178 : i32 to vector<4x10xi32>
    %250 = arith.muli %249, %239 : vector<4x10xi32>
    %c1_i32_179 = arith.constant 1 : i32
    %251 = vector.broadcast %c1_i32_179 : i32 to vector<4x10xi32>
    %252 = arith.addi %250, %251 : vector<4x10xi32>
    %253 = arith.cmpi eq, %240, %252 : vector<4x10xi32>
    %254 = arith.extui %253 : vector<4x10xi1> to vector<4x10xi32>
    %255 = arith.sitofp %254 : vector<4x10xi32> to vector<4x10xf32>
    %cst_180 = arith.constant dense<0.000000e+00> : vector<4x16xf32>
    %256 = tpu.matmul %255, %238, %cst_180 {dimension_numbers = #tpu.dot_dimension_numbers<[1], [0], [0], [1], [0, 0, 1, 1], [], []>} : vector<4x10xf32>, vector<10x16xf32>, vector<4x16xf32> -> vector<4x16xf32>
    %c2_i32_181 = arith.constant 2 : i32
    %257 = vector.broadcast %c2_i32_181 : i32 to vector<4x10xi32>
    %258 = arith.muli %257, %239 : vector<4x10xi32>
    %c2_i32_182 = arith.constant 2 : i32
    %259 = vector.broadcast %c2_i32_182 : i32 to vector<4x10xi32>
    %260 = arith.addi %258, %259 : vector<4x10xi32>
    %261 = arith.cmpi eq, %240, %260 : vector<4x10xi32>
    %262 = arith.extui %261 : vector<4x10xi1> to vector<4x10xi32>
    %263 = arith.sitofp %262 : vector<4x10xi32> to vector<4x10xf32>
    %cst_183 = arith.constant dense<0.000000e+00> : vector<4x16xf32>
    %264 = tpu.matmul %263, %238, %cst_183 {dimension_numbers = #tpu.dot_dimension_numbers<[1], [0], [0], [1], [0, 0, 1, 1], [], []>} : vector<4x10xf32>, vector<10x16xf32>, vector<4x16xf32> -> vector<4x16xf32>
    %c2_i32_184 = arith.constant 2 : i32
    %265 = vector.broadcast %c2_i32_184 : i32 to vector<4x10xi32>
    %266 = arith.muli %265, %239 : vector<4x10xi32>
    %c3_i32_185 = arith.constant 3 : i32
    %267 = vector.broadcast %c3_i32_185 : i32 to vector<4x10xi32>
    %268 = arith.addi %266, %267 : vector<4x10xi32>
    %269 = arith.cmpi eq, %240, %268 : vector<4x10xi32>
    %270 = arith.extui %269 : vector<4x10xi1> to vector<4x10xi32>
    %271 = arith.sitofp %270 : vector<4x10xi32> to vector<4x10xf32>
    %cst_186 = arith.constant dense<0.000000e+00> : vector<4x16xf32>
    %272 = tpu.matmul %271, %238, %cst_186 {dimension_numbers = #tpu.dot_dimension_numbers<[1], [0], [0], [1], [0, 0, 1, 1], [], []>} : vector<4x10xf32>, vector<10x16xf32>, vector<4x16xf32> -> vector<4x16xf32>
    %273 = tpu.concatenate %248, %256, %264, %272 in 1 : vector<4x16xf32>, vector<4x16xf32>, vector<4x16xf32>, vector<4x16xf32> -> vector<4x64xf32>
    %c0_187 = arith.constant 0 : index
    %c0_188 = arith.constant 0 : index
    %274 = vector.load %arg14[%c0_187, %c0_188] : memref<64x32xf32, #tpu.memory_space<vmem>>, vector<64x32xf32>
    %cst_189 = arith.constant dense<0.000000e+00> : vector<4x32xf32>
    %275 = tpu.matmul %273, %274, %cst_189 {dimension_numbers = #tpu.dot_dimension_numbers<[1], [0], [0], [1], [0, 0, 1, 1], [], []>} : vector<4x64xf32>, vector<64x32xf32>, vector<4x32xf32> -> vector<4x32xf32>
    %c0_190 = arith.constant 0 : index
    %c0_191 = arith.constant 0 : index
    %276 = vector.load %arg15[%c0_190, %c0_191] : memref<1x32xf32, #tpu.memory_space<vmem>>, vector<1x32xf32>
    %277 = vector.broadcast %276 : vector<1x32xf32> to vector<4x32xf32>
    %278 = arith.addf %275, %277 : vector<4x32xf32>
    %cst_192 = arith.constant 0.000000e+00 : f32
    %279 = vector.broadcast %cst_192 : f32 to vector<4x32xf32>
    %280 = arith.cmpf ogt, %278, %279 : vector<4x32xf32>
    %cst_193 = arith.constant 2.000000e-01 : f32
    %281 = vector.broadcast %cst_193 : f32 to vector<4x32xf32>
    %282 = arith.mulf %281, %278 : vector<4x32xf32>
    %283 = arith.select %280, %278, %282 : vector<4x32xi1>, vector<4x32xf32>
    %cst_194 = arith.constant 0.000000e+00 : f32
    %284 = vector.broadcast %cst_194 : f32 to vector<8x32xf32>
    %c0_195 = arith.constant 0 : index
    %c0_196 = arith.constant 0 : index
    %285 = vector.load %arg28[%c0_195, %c0_196] : memref<16x32xf32, #tpu.memory_space<vmem>>, vector<8x32xf32>
    tpu.vector_store %arg28[%c0_195, %c0_196], %284 {strides = array<i32>} : memref<16x32xf32, #tpu.memory_space<vmem>>, vector<8x32xf32>,
    %cst_197 = arith.constant 0.000000e+00 : f32
    %286 = vector.broadcast %cst_197 : f32 to vector<4x32xf32>
    %c12 = arith.constant 12 : index
    %c0_198 = arith.constant 0 : index
    %287 = vector.load %arg28[%c12, %c0_198] : memref<16x32xf32, #tpu.memory_space<vmem>>, vector<4x32xf32>
    tpu.vector_store %arg28[%c12, %c0_198], %286 {strides = array<i32>} : memref<16x32xf32, #tpu.memory_space<vmem>>, vector<4x32xf32>,
    %c8_199 = arith.constant 8 : index
    %c0_200 = arith.constant 0 : index
    %288 = vector.load %arg28[%c8_199, %c0_200] : memref<16x32xf32, #tpu.memory_space<vmem>>, vector<4x32xf32>
    tpu.vector_store %arg28[%c8_199, %c0_200], %283 {strides = array<i32>} : memref<16x32xf32, #tpu.memory_space<vmem>>, vector<4x32xf32>,
    %c8_201 = arith.constant 8 : index
    %c0_202 = arith.constant 0 : index
    %289 = vector.load %arg28[%c8_201, %c0_202] : memref<16x32xf32, #tpu.memory_space<vmem>>, vector<4x32xf32>
    %c7_203 = arith.constant 7 : index
    %c0_204 = arith.constant 0 : index
    %290 = vector.load %arg28[%c7_203, %c0_204] : memref<16x32xf32, #tpu.memory_space<vmem>>, vector<4x32xf32>
    %c9_205 = arith.constant 9 : index
    %c0_206 = arith.constant 0 : index
    %291 = vector.load %arg28[%c9_205, %c0_206] : memref<16x32xf32, #tpu.memory_space<vmem>>, vector<4x32xf32>
    %292 = tpu.concatenate %290, %289, %291 in 1 : vector<4x32xf32>, vector<4x32xf32>, vector<4x32xf32> -> vector<4x96xf32>
    %c0_207 = arith.constant 0 : index
    %c0_208 = arith.constant 0 : index
    %c0_209 = arith.constant 0 : index
    %293 = vector.load %arg16[%c0_207, %c0_208, %c0_209] : memref<2x96x32xf32, #tpu.memory_space<vmem>>, vector<1x96x32xf32>
    %294 = vector.shape_cast %293 : vector<1x96x32xf32> to vector<96x32xf32>
    %cst_210 = arith.constant dense<0.000000e+00> : vector<4x32xf32>
    %295 = tpu.matmul %292, %294, %cst_210 {dimension_numbers = #tpu.dot_dimension_numbers<[1], [0], [0], [1], [0, 0, 1, 1], [], []>} : vector<4x96xf32>, vector<96x32xf32>, vector<4x32xf32> -> vector<4x32xf32>
    %c0_211 = arith.constant 0 : index
    %c0_212 = arith.constant 0 : index
    %c0_213 = arith.constant 0 : index
    %296 = vector.load %arg17[%c0_211, %c0_212, %c0_213] : memref<2x1x32xf32, #tpu.memory_space<vmem>>, vector<1x1x32xf32>
    %297 = vector.shape_cast %296 : vector<1x1x32xf32> to vector<1x32xf32>
    %298 = vector.broadcast %297 : vector<1x32xf32> to vector<4x32xf32>
    %299 = arith.addf %295, %298 : vector<4x32xf32>
    %300 = arith.addf %299, %289 : vector<4x32xf32>
    %cst_214 = arith.constant 0.000000e+00 : f32
    %301 = vector.broadcast %cst_214 : f32 to vector<4x32xf32>
    %302 = arith.cmpf ogt, %300, %301 : vector<4x32xf32>
    %cst_215 = arith.constant 2.000000e-01 : f32
    %303 = vector.broadcast %cst_215 : f32 to vector<4x32xf32>
    %304 = arith.mulf %303, %300 : vector<4x32xf32>
    %305 = arith.select %302, %300, %304 : vector<4x32xi1>, vector<4x32xf32>
    %c8_216 = arith.constant 8 : index
    %c0_217 = arith.constant 0 : index
    %306 = vector.load %arg28[%c8_216, %c0_217] : memref<16x32xf32, #tpu.memory_space<vmem>>, vector<4x32xf32>
    tpu.vector_store %arg28[%c8_216, %c0_217], %305 {strides = array<i32>} : memref<16x32xf32, #tpu.memory_space<vmem>>, vector<4x32xf32>,
    %c7_218 = arith.constant 7 : index
    %c0_219 = arith.constant 0 : index
    %307 = vector.load %arg28[%c7_218, %c0_219] : memref<16x32xf32, #tpu.memory_space<vmem>>, vector<4x32xf32>
    %c9_220 = arith.constant 9 : index
    %c0_221 = arith.constant 0 : index
    %308 = vector.load %arg28[%c9_220, %c0_221] : memref<16x32xf32, #tpu.memory_space<vmem>>, vector<4x32xf32>
    %309 = tpu.concatenate %307, %305, %308 in 1 : vector<4x32xf32>, vector<4x32xf32>, vector<4x32xf32> -> vector<4x96xf32>
    %c1_222 = arith.constant 1 : index
    %c0_223 = arith.constant 0 : index
    %c0_224 = arith.constant 0 : index
    %310 = vector.load %arg16[%c1_222, %c0_223, %c0_224] : memref<2x96x32xf32, #tpu.memory_space<vmem>>, vector<1x96x32xf32>
    %311 = vector.shape_cast %310 : vector<1x96x32xf32> to vector<96x32xf32>
    %cst_225 = arith.constant dense<0.000000e+00> : vector<4x32xf32>
    %312 = tpu.matmul %309, %311, %cst_225 {dimension_numbers = #tpu.dot_dimension_numbers<[1], [0], [0], [1], [0, 0, 1, 1], [], []>} : vector<4x96xf32>, vector<96x32xf32>, vector<4x32xf32> -> vector<4x32xf32>
    %c1_226 = arith.constant 1 : index
    %c0_227 = arith.constant 0 : index
    %c0_228 = arith.constant 0 : index
    %313 = vector.load %arg17[%c1_226, %c0_227, %c0_228] : memref<2x1x32xf32, #tpu.memory_space<vmem>>, vector<1x1x32xf32>
    %314 = vector.shape_cast %313 : vector<1x1x32xf32> to vector<1x32xf32>
    %315 = vector.broadcast %314 : vector<1x32xf32> to vector<4x32xf32>
    %316 = arith.addf %312, %315 : vector<4x32xf32>
    %317 = arith.addf %316, %305 : vector<4x32xf32>
    %cst_229 = arith.constant 0.000000e+00 : f32
    %318 = vector.broadcast %cst_229 : f32 to vector<4x32xf32>
    %319 = arith.cmpf ogt, %317, %318 : vector<4x32xf32>
    %cst_230 = arith.constant 2.000000e-01 : f32
    %320 = vector.broadcast %cst_230 : f32 to vector<4x32xf32>
    %321 = arith.mulf %320, %317 : vector<4x32xf32>
    %322 = arith.select %319, %317, %321 : vector<4x32xi1>, vector<4x32xf32>
    %c8_231 = arith.constant 8 : index
    %c0_232 = arith.constant 0 : index
    %323 = vector.load %arg28[%c8_231, %c0_232] : memref<16x32xf32, #tpu.memory_space<vmem>>, vector<4x32xf32>
    tpu.vector_store %arg28[%c8_231, %c0_232], %322 {strides = array<i32>} : memref<16x32xf32, #tpu.memory_space<vmem>>, vector<4x32xf32>,
    %c0_233 = arith.constant 0 : index
    %c0_234 = arith.constant 0 : index
    %c0_235 = arith.constant 0 : index
    %324 = vector.load %arg23[%c0_233, %c0_234, %c0_235] : memref<1x4x32xf32, #tpu.memory_space<vmem>>, vector<1x4x32xf32>
    %325 = vector.shape_cast %324 : vector<1x4x32xf32> to vector<4x32xf32>
    %326 = vector.shape_cast %322 : vector<4x32xf32> to vector<1x4x32xf32>
    tpu.vector_store %arg23[%c0_233, %c0_234, %c0_235], %326 {strides = array<i32>} : memref<1x4x32xf32, #tpu.memory_space<vmem>>, vector<1x4x32xf32>,
    %c0_236 = arith.constant 0 : index
    %c0_237 = arith.constant 0 : index
    %327 = vector.load %arg18[%c0_236, %c0_237] : memref<32x16xf32, #tpu.memory_space<vmem>>, vector<32x16xf32>
    %cst_238 = arith.constant dense<0.000000e+00> : vector<4x16xf32>
    %328 = tpu.matmul %322, %327, %cst_238 {dimension_numbers = #tpu.dot_dimension_numbers<[1], [0], [0], [1], [0, 0, 1, 1], [], []>} : vector<4x32xf32>, vector<32x16xf32>, vector<4x16xf32> -> vector<4x16xf32>
    %c0_239 = arith.constant 0 : index
    %c0_240 = arith.constant 0 : index
    %329 = vector.load %arg19[%c0_239, %c0_240] : memref<1x16xf32, #tpu.memory_space<vmem>>, vector<1x16xf32>
    %330 = vector.broadcast %329 : vector<1x16xf32> to vector<4x16xf32>
    %331 = arith.addf %328, %330 : vector<4x16xf32>
    %c0_241 = arith.constant 0 : index
    %c0_242 = arith.constant 0 : index
    %c0_243 = arith.constant 0 : index
    %332 = vector.load %arg24[%c0_241, %c0_242, %c0_243] : memref<1x4x16xf32, #tpu.memory_space<vmem>>, vector<1x4x16xf32>
    %333 = vector.shape_cast %332 : vector<1x4x16xf32> to vector<4x16xf32>
    %334 = vector.shape_cast %331 : vector<4x16xf32> to vector<1x4x16xf32>
    tpu.vector_store %arg24[%c0_241, %c0_242, %c0_243], %334 {strides = array<i32>} : memref<1x4x16xf32, #tpu.memory_space<vmem>>, vector<1x4x16xf32>,
    return
  }
  func.func @transform_0(%arg0: i32) -> (i32, i32, i32) {
    %c0_i32 = arith.constant 0 : i32
    %c0_i32_0 = arith.constant 0 : i32
    %c0_i32_1 = arith.constant 0 : i32
    return %arg0, %c0_i32, %c0_i32_0 : i32, i32, i32
  }
  func.func @transform_1(%arg0: i32) -> (i32, i32) {
    %c0_i32 = arith.constant 0 : i32
    %c0_i32_0 = arith.constant 0 : i32
    %c0_i32_1 = arith.constant 0 : i32
    return %c0_i32, %c0_i32_0 : i32, i32
  }
  func.func @transform_2(%arg0: i32) -> (i32, i32) {
    %c0_i32 = arith.constant 0 : i32
    %c0_i32_0 = arith.constant 0 : i32
    %c0_i32_1 = arith.constant 0 : i32
    return %c0_i32, %c0_i32_0 : i32, i32
  }
  func.func @transform_3(%arg0: i32) -> (i32, i32, i32) {
    %c0_i32 = arith.constant 0 : i32
    %c0_i32_0 = arith.constant 0 : i32
    %c0_i32_1 = arith.constant 0 : i32
    %c0_i32_2 = arith.constant 0 : i32
    return %c0_i32, %c0_i32_0, %c0_i32_1 : i32, i32, i32
  }
  func.func @transform_4(%arg0: i32) -> (i32, i32, i32) {
    %c0_i32 = arith.constant 0 : i32
    %c0_i32_0 = arith.constant 0 : i32
    %c0_i32_1 = arith.constant 0 : i32
    %c0_i32_2 = arith.constant 0 : i32
    return %c0_i32, %c0_i32_0, %c0_i32_1 : i32, i32, i32
  }
  func.func @transform_5(%arg0: i32) -> (i32, i32) {
    %c0_i32 = arith.constant 0 : i32
    %c0_i32_0 = arith.constant 0 : i32
    %c0_i32_1 = arith.constant 0 : i32
    return %c0_i32, %c0_i32_0 : i32, i32
  }
  func.func @transform_6(%arg0: i32) -> (i32, i32) {
    %c0_i32 = arith.constant 0 : i32
    %c0_i32_0 = arith.constant 0 : i32
    %c0_i32_1 = arith.constant 0 : i32
    return %c0_i32, %c0_i32_0 : i32, i32
  }
  func.func @transform_7(%arg0: i32) -> (i32, i32, i32) {
    %c0_i32 = arith.constant 0 : i32
    %c0_i32_0 = arith.constant 0 : i32
    %c0_i32_1 = arith.constant 0 : i32
    %c0_i32_2 = arith.constant 0 : i32
    return %c0_i32, %c0_i32_0, %c0_i32_1 : i32, i32, i32
  }
  func.func @transform_8(%arg0: i32) -> (i32, i32, i32) {
    %c0_i32 = arith.constant 0 : i32
    %c0_i32_0 = arith.constant 0 : i32
    %c0_i32_1 = arith.constant 0 : i32
    %c0_i32_2 = arith.constant 0 : i32
    return %c0_i32, %c0_i32_0, %c0_i32_1 : i32, i32, i32
  }
  func.func @transform_9(%arg0: i32) -> (i32, i32) {
    %c0_i32 = arith.constant 0 : i32
    %c0_i32_0 = arith.constant 0 : i32
    %c0_i32_1 = arith.constant 0 : i32
    return %c0_i32, %c0_i32_0 : i32, i32
  }
  func.func @transform_10(%arg0: i32) -> (i32, i32) {
    %c0_i32 = arith.constant 0 : i32
    %c0_i32_0 = arith.constant 0 : i32
    %c0_i32_1 = arith.constant 0 : i32
    return %c0_i32, %c0_i32_0 : i32, i32
  }
  func.func @transform_11(%arg0: i32) -> (i32, i32, i32) {
    %c0_i32 = arith.constant 0 : i32
    %c0_i32_0 = arith.constant 0 : i32
    %c0_i32_1 = arith.constant 0 : i32
    %c0_i32_2 = arith.constant 0 : i32
    return %c0_i32, %c0_i32_0, %c0_i32_1 : i32, i32, i32
  }
  func.func @transform_12(%arg0: i32) -> (i32, i32, i32) {
    %c0_i32 = arith.constant 0 : i32
    %c0_i32_0 = arith.constant 0 : i32
    %c0_i32_1 = arith.constant 0 : i32
    %c0_i32_2 = arith.constant 0 : i32
    return %c0_i32, %c0_i32_0, %c0_i32_1 : i32, i32, i32
  }
  func.func @transform_13(%arg0: i32) -> (i32, i32) {
    %c0_i32 = arith.constant 0 : i32
    %c0_i32_0 = arith.constant 0 : i32
    %c0_i32_1 = arith.constant 0 : i32
    return %c0_i32, %c0_i32_0 : i32, i32
  }
  func.func @transform_14(%arg0: i32) -> (i32, i32) {
    %c0_i32 = arith.constant 0 : i32
    %c0_i32_0 = arith.constant 0 : i32
    %c0_i32_1 = arith.constant 0 : i32
    return %c0_i32, %c0_i32_0 : i32, i32
  }
  func.func @transform_15(%arg0: i32) -> (i32, i32, i32) {
    %c0_i32 = arith.constant 0 : i32
    %c0_i32_0 = arith.constant 0 : i32
    %c0_i32_1 = arith.constant 0 : i32
    %c0_i32_2 = arith.constant 0 : i32
    return %c0_i32, %c0_i32_0, %c0_i32_1 : i32, i32, i32
  }
  func.func @transform_16(%arg0: i32) -> (i32, i32, i32) {
    %c0_i32 = arith.constant 0 : i32
    %c0_i32_0 = arith.constant 0 : i32
    %c0_i32_1 = arith.constant 0 : i32
    %c0_i32_2 = arith.constant 0 : i32
    return %c0_i32, %c0_i32_0, %c0_i32_1 : i32, i32, i32
  }
  func.func @transform_17(%arg0: i32) -> (i32, i32) {
    %c0_i32 = arith.constant 0 : i32
    %c0_i32_0 = arith.constant 0 : i32
    %c0_i32_1 = arith.constant 0 : i32
    return %c0_i32, %c0_i32_0 : i32, i32
  }
  func.func @transform_18(%arg0: i32) -> (i32, i32) {
    %c0_i32 = arith.constant 0 : i32
    %c0_i32_0 = arith.constant 0 : i32
    %c0_i32_1 = arith.constant 0 : i32
    return %c0_i32, %c0_i32_0 : i32, i32
  }
  func.func @transform_19(%arg0: i32) -> (i32, i32, i32) {
    %c0_i32 = arith.constant 0 : i32
    %c0_i32_0 = arith.constant 0 : i32
    %c0_i32_1 = arith.constant 0 : i32
    return %arg0, %c0_i32, %c0_i32_0 : i32, i32, i32
  }
  func.func @transform_20(%arg0: i32) -> (i32, i32, i32) {
    %c0_i32 = arith.constant 0 : i32
    %c0_i32_0 = arith.constant 0 : i32
    %c0_i32_1 = arith.constant 0 : i32
    return %arg0, %c0_i32, %c0_i32_0 : i32, i32, i32
  }
  func.func @transform_21(%arg0: i32) -> (i32, i32, i32) {
    %c0_i32 = arith.constant 0 : i32
    %c0_i32_0 = arith.constant 0 : i32
    %c0_i32_1 = arith.constant 0 : i32
    return %arg0, %c0_i32, %c0_i32_0 : i32, i32, i32
  }
  func.func @transform_22(%arg0: i32) -> (i32, i32, i32) {
    %c0_i32 = arith.constant 0 : i32
    %c0_i32_0 = arith.constant 0 : i32
    %c0_i32_1 = arith.constant 0 : i32
    return %arg0, %c0_i32, %c0_i32_0 : i32, i32, i32
  }
  func.func @transform_23(%arg0: i32) -> (i32, i32, i32) {
    %c0_i32 = arith.constant 0 : i32
    %c0_i32_0 = arith.constant 0 : i32
    %c0_i32_1 = arith.constant 0 : i32
    return %arg0, %c0_i32, %c0_i32_0 : i32, i32, i32
  }
}

</mosaic_0001>

<bundles_post_ra>
// kernel: encoder_sc_forward.1
= control target key start
LH: loop header
LB: loop body
LE: loop exit
PB: predicated region body
PF: predicated region fallthrough
CT: control target
= control target key end

     0   :  { %s3389_s0 = inlined_call_operand.vmem [shape: f32[2,34,8], index: 0, kind: input, shape index: {}]   ;;  %s3390_s1 = inlined_call_operand.vmem [shape: f32[24,8], index: 1, kind: input, shape index: {}]   ;;  %s3391_s2 = inlined_call_operand.vmem [shape: f32[1,8], index: 2, kind: input, shape index: {}]   ;;  %s3392_s3 = inlined_call_operand.vmem [shape: f32[2,24,8], index: 3, kind: input, shape index: {}]   ;;  %s3393_s4 = inlined_call_operand.vmem [shape: f32[2,1,8], index: 4, kind: input, shape index: {}]   ;;  %s3394_s5 = inlined_call_operand.vmem [shape: f32[32,8], index: 5, kind: input, shape index: {}]   ;;  %s3395_s6 = inlined_call_operand.vmem [shape: f32[1,8], index: 6, kind: input, shape index: {}]   ;;  %s3396_s7 = inlined_call_operand.vmem [shape: f32[2,24,8], index: 7, kind: input, shape index: {}]   ;;  %s3397_s8 = inlined_call_operand.vmem [shape: f32[2,1,8], index: 8, kind: input, shape index: {}]   ;;  %s3398_s9 = inlined_call_operand.vmem [shape: f32[32,16], index: 9, kind: input, shape index: {}]   ;;  %s3399_s10 = inlined_call_operand.vmem [shape: f32[1,16], index: 10, kind: input, shape index: {}]   ;;  %s3400_s11 = inlined_call_operand.vmem [shape: f32[2,48,16], index: 11, kind: input, shape index: {}]   ;;  %s3401_s12 = inlined_call_operand.vmem [shape: f32[2,1,16], index: 12, kind: input, shape index: {}]   ;;  %s3402_s13 = inlined_call_operand.vmem [shape: f32[64,32], index: 13, kind: input, shape index: {}]   ;;  %s3403_s14 = inlined_call_operand.vmem [shape: f32[1,32], index: 14, kind: input, shape index: {}]   ;;  %s3404_s15 = inlined_call_operand.vmem [shape: f32[2,96,32], index: 15, kind: input, shape index: {}]   ;;  %s3405_s16 = inlined_call_operand.vmem [shape: f32[2,1,32], index: 16, kind: input, shape index: {}]   ;;  %s3406_s17 = inlined_call_operand.vmem [shape: f32[32,16], index: 17, kind: input, shape index: {}]   ;;  %s3407_s18 = inlined_call_operand.vmem [shape: f32[1,16], index: 18, kind: input, shape index: {}]   ;;  %s3408_s19 = inlined_call_operand.vmem [shape: f32[2,32,8], index: 19, kind: output, shape index: {0}]   ;;  %s3409_s20 = inlined_call_operand.vmem [shape: f32[2,16,8], index: 20, kind: output, shape index: {1}]   ;;  %s3410_s21 = inlined_call_operand.hbm [shape: f32[2,8,16], index: 21, kind: output, shape index: {2}]   ;;  %s3411_s22 = inlined_call_operand.hbm [shape: f32[2,4,32], index: 22, kind: output, shape index: {3}]   ;;  %s3412_s23 = inlined_call_operand.hbm [shape: f32[2,4,16], index: 23, kind: output, shape index: {4}]  }
   0x1   :  { %3438 = sst [smem:[#allocation18_spill]] %s3389_s0 }
   0x2   :  { %3439 = sst [smem:[#allocation19_spill]] %s3390_s1 }
   0x3   :  { %3440 = sst [smem:[#allocation20_spill]] %s3391_s2 }
   0x4   :  { %3441 = sst [smem:[#allocation21_spill]] %s3392_s3 }
   0x5   :  { %3442 = sst [smem:[#allocation22_spill]] %s3393_s4 }
   0x6   :  { %3443 = sst [smem:[#allocation23_spill]] %s3394_s5 }
   0x7   :  { %3444 = sst [smem:[#allocation24_spill]] %s3395_s6 }
   0x8   :  { %3445 = sst [smem:[#allocation25_spill]] %s3396_s7 }
   0x9   :  { %3446 = sst [smem:[#allocation26_spill]] %s3397_s8 }
   0xa   :  { %3447 = sst [smem:[#allocation27_spill]] %s3398_s9 }
   0xb   :  { %3448 = sst [smem:[#allocation28_spill]] %s3399_s10 }
   0xc   :  { %3449 = sst [smem:[#allocation29_spill]] %s3400_s11 }
   0xd   :  { %3450 = sst [smem:[#allocation30_spill]] %s3401_s12 }
   0xe   :  { %3451 = sst [smem:[#allocation31_spill]] %s3402_s13 }
   0xf   :  { %29 = vsyncpa [#allocation7], 0 }
  0x10   :  { %31 = vsyncpa [#allocation7 + $0x1], 0 }
  0x11   :  { %32 = vsyncpa [#allocation9], 0 }
  0x12   :  { %34 = vsyncpa [#allocation9 + $0x1], 0  ;;  %s2732_s4 = smov 0   ;;  %s2734_s30 = smov 0  }
  0x13   :  { %s2736_s24 = smov 0   ;;  %s2738_s25 = smov 0  }
  0x14 LB: > { %3452 = sst [smem:[#allocation13_spill]] %s2591_s4  ;;  %s2753_s5 = sadd.s32 4294967295, %s2603_s25   ;;  %s2603_s25 = sphi %s2738_s25, %s3483_s25   ;;  %s2599_s24 = sphi %s2736_s24, %s3485_s24   ;;  %s2595_s30 = sphi %s2734_s30, %s3487_s30   ;;  %s2591_s4 = sphi %s2732_s4, %s3486_s4  }
  0x15   : > { %3453 = sst [smem:[#allocation14_spill]] %s2599_s24  ;;  %s3418_s1 = sadd.s32 4294967294, %s2603_s25  }
  0x16   : > { %s2757_s26 = sadd.s32 1, %s2603_s25   ;;  %s503_s2 = sadd.s32 1, %s2599_s24 }
  0x17   : > { %3454 = sst [smem:[#allocation15_spill]] %s2757_s26  ;;  %s500_s6 = ssub.s32 %s2603_s25, %s2757_s26 }
  0x18   : > { %p513_p0 = scmp.ne.s32.totalorder %s2599_s24, %s2595_s30  ;;  %p501_p1 = scmp.eq.s32.totalorder %s500_s6, 0 }
  0x19   : > { %p514_p2 = scmp.eq.s32.totalorder %s2753_s5, 1  ;;  %p519_p3 = scmp.ne.s32.totalorder %s2595_s30, %s2591_s4 }
  0x1a   : > { %p520_p4 = scmp.eq.s32.totalorder %s3418_s1, 1  ;;  %p2300_p7 = scmp.ge.s32.totalorder %s2603_s25, 1 }
  0x1b   : > { %s2770_s27 = scalar_select %p501_p1, %s2599_s24, %s503_s2  }
  0x1c   : > { %p2772_p5 = por %p514_p2, %p513_p0  ;;  %p2776_p6 = por %p520_p4, %p519_p3 }
  0x1d   : > { %3455 = sst [smem:[#allocation16_spill]] %s2770_s27  ;;  %p652_p8 = scmp.lt.s32.totalorder %s2603_s25, 3 }
  0x1e   : > { %s3457_s28 = scalar_select %p2776_p6, 1, 0 }
  0x1f   : > { %p653_p9 = pnand %p2300_p7, %p652_p8 }
  0x20   : > { %3458 = sst [smem:[#allocation17_spill]] %s3457_s28  ;;  %p736_p10 = scmp.lt.s32.totalorder (!%p653_p9), %s2753_s5, 1 }
  0x21   : > { %656 = sbr.rel (%p653_p9) target bundleno = 3781 (0xec5), region = 96  ;;  %s3459_s6 = sld [smem:[#allocation18_spill]] (!%p653_p9) }
  0x22   : > { %s3425_s27 = smov (!%p653_p9), 8   ;;  %s3462_s0 = sld [smem:[#allocation21_spill]] (!%p653_p9) }
  0x23   : > { %s3463_s2 = sld [smem:[#allocation22_spill]] (!%p653_p9) }
  0x24   : > { %s3468_s26 = sld [smem:[#allocation24_spill]] (!%p653_p9) }
  0x25   : > { %s3470_s8 = sld [smem:[#allocation26_spill]] (!%p653_p9) }
  0x26   : > { %s2784_s29 = scalar_select %p736_p10, %s2753_s5, 1  ;;  %vm751_vm0 = vcmask 64512   ;;  %vm802_vm1 = vcmask 130048   ;;  %vm814_vm2 = vcmask 195584   ;;  %v2607_v31 = vmov 0.0  }
  0x27   : > { %753 = vst.msk [vmem:[#allocation2 + $0x28] sm:$0xff] %vm751_vm0, %v2607_v31  ;;  %vm1139_vm15 = vcmask 1041408   ;;  %s3472_s9 = sld [smem:[#allocation27_spill]] }
  0x28   : > { %s2411_s3 = smul.u32 40, %s2784_s29  ;;  %752 = vst.msk [vmem:[#allocation2] sm:$0xff] %vm751_vm0, %v2607_v31  ;;  %v926_v57 = vld [vmem:[%s3462_s0 + $0x10] sm:$0xff]  ;;  %v925_v58 = vld [vmem:[%s3462_s0 + $0x8] sm:$0xff]  ;;  %v924_v59 = vld [vmem:[%s3462_s0] sm:$0xff]  ;;  %s2406_s24 = sshll.u32 %s2784_s29, 5 }
  0x29   : > { %1351 = vst.msk [vmem:[#allocation3] sm:$0xff] %vm751_vm0, %v2607_v31  ;;  %s745_s28 = scalar_lea.vmem %s3408_s19, %s2406_s24  ;;  %s3464_s24 = sld [smem:[#allocation23_spill]] }
  0x2a   : > { %s2790_s1 = scalar_lea.vmem %s3459_s6, %s2411_s3  ;;  %s3427_s3 = smov 16   ;;  %1352 = vst.msk [vmem:[#allocation3 + $0x18] sm:$0xff] %vm751_vm0, %v2607_v31 }
  0x2b   : > { %v758_v0 = vld [vmem:[%s2790_s1 + $0x1] sm:$0xff]  ;;  %v759_v1 = vld [vmem:[%s2790_s1 + $0x9] sm:$0xff]  ;;  %v760_v2 = vld [vmem:[%s2790_s1 + $0x11] sm:$0xff]  ;;  %s3460_s6 = sld [smem:[#allocation19_spill]]  ;;  %1645 = vst.msk [vmem:[#allocation4] sm:$0xff] %vm802_vm1, %v2607_v31 }
  0x2c   : > { %770 = vrot.lane.b32.xlu0 %v758_v0, %s3425_s27  ;;  %772 = vrot.lane.b32.xlu1 %v759_v1, %s3425_s27  ;;  %v762_v3 = vld [vmem:[%s2790_s1 + $0x2] sm:$0xff]  ;;  %v763_v4 = vld [vmem:[%s2790_s1 + $0xa] sm:$0xff]  ;;  %1646 = vst.msk [vmem:[#allocation4 + $0x10] sm:$0xff] %vm802_vm1, %v2607_v31  ;;  %s3473_s10 = sld [smem:[#allocation28_spill]] }
  0x2d   : > { %774 = vrot.lane.b32.xlu2 %v760_v2, %s3425_s27  ;;  %v764_v5 = vld [vmem:[%s2790_s1 + $0x12] sm:$0xff]  ;;  %v765_v7 = vld [vmem:[%s2790_s1 + $0x1a] sm:$0xff]  ;;  %v755_v19 = vld [vmem:[%s2790_s1 + $0x8] sm:$0xff]  ;;  %s3474_s11 = sld [smem:[#allocation29_spill]] }
  0x2e   : > { %v761_v6 = vld [vmem:[%s2790_s1 + $0x19] sm:$0xff]  ;;  %v756_v24 = vld [vmem:[%s2790_s1 + $0x10] sm:$0xff]  ;;  %s3475_s12 = sld [smem:[#allocation30_spill]] }
  0x2f   : > { %v754_v13 = vld [vmem:[%s2790_s1] sm:$0xff]  ;;  %v757_v21 = vld [vmem:[%s2790_s1 + $0x18] sm:$0xff]  ;;  %s3461_s1 = sld [smem:[#allocation20_spill]] }
  0x30   : > { %s3477_s13 = sld [smem:[#allocation31_spill]] }
  0x31   : > { %v809_v8 = vld [vmem:[%s3460_s6 + $0x10] sm:$0xff]  ;;  %v808_v9 = vld [vmem:[%s3460_s6 + $0x8] sm:$0xff]  ;;  %v807_v10 = vld [vmem:[%s3460_s6] sm:$0xff]  ;;  %s3467_s6 = smov 8  }
  0x32   : > { %840 = vmatpush.msra.mxu0 %v809_v8  ;;  %2408 = vmatpush.msra.mxu1 %v809_v8 }
  0x34   : > { %786 = vrot.lane.b32.xlu0 %v762_v3, %s3427_s3  ;;  %788 = vrot.lane.b32.xlu1 %v763_v4, %s3427_s3 }
  0x35   : > { %790 = vrot.lane.b32.xlu2 %v764_v5, %s3427_s3  ;;  %841 = vmatpush.msra.mxu0 %v808_v9  ;;  %v2468_v32 = vld [vmem:[%s3461_s1] ss:$0 sm:$0xff]  ;;  %s3465_s1 = smov %s3464_s24 }
  0x36   : > { %2409 = vmatpush.msra.mxu1 %v808_v9 }
  0x37   : > { %842 = vmatpush.msra.mxu0 %v807_v10 }
  0x38   : > { %2410 = vmatpush.msra.mxu1 %v807_v10 }
  0x3a   : > { %956 = vmatpush.msrb.mxu1 %v926_v57 }
  0x3c   : > { %776 = vrot.lane.b32.xlu0 %v761_v6, %s3425_s27  ;;  %792 = vrot.lane.b32.xlu1 %v765_v7, %s3427_s3 }
  0x3d   : > { %957 = vmatpush.msrb.mxu1 %v925_v58 }
  0x3f   : > { %958 = vmatpush.msrb.mxu1 %v924_v59 }
  0x87   : > { %v775_v18 = vpop.permute.xlu2 %774 }
  0x88   : > { %v800_v28 = vsel %vm751_vm0, %v756_v24, %v775_v18 }
  0x8f   : > { %v791_v29 = vpop.permute.xlu2 %790 }
  0x90   : > { %v805_v30 = vsel %vm802_vm1, %v800_v28, %v791_v29 }
  0x9e   : > { %v771_v11 = vpop.permute.xlu0 %770  ;;  %v773_v12 = vpop.permute.xlu1 %772 }
  0x9f   : > { %v798_v14 = vsel %vm751_vm0, %v754_v13, %v771_v11  ;;  %v799_v20 = vsel %vm751_vm0, %v755_v19, %v773_v12 }
  0xa6   : > { %v787_v15 = vpop.permute.xlu0 %786  ;;  %v789_v16 = vpop.permute.xlu1 %788 }
  0xa7   : > { %v803_v17 = vsel %vm802_vm1, %v798_v14, %v787_v15  ;;  %v804_v25 = vsel %vm802_vm1, %v799_v20, %v789_v16  ;;  %v2469_v16 = vld [vmem:[%s3463_s2] ss:$0 sm:$0xff] }
  0xa8   : > { %2309 = vmatmul.msk.f32.vlgmr.msra.gmra.mxu0 %vm814_vm2, %v803_v17 }
  0xae   : > { %v777_v22 = vpop.permute.xlu0 %776  ;;  %v793_v23 = vpop.permute.xlu1 %792 }
  0xaf   : > { %v801_v26 = vsel %vm751_vm0, %v757_v21, %v777_v22 }
  0xb0   : > { %2310 = vmatmul.msk.f32.gmra.mxu0 %vm814_vm2, %v804_v25  ;;  %v806_v27 = vsel %vm802_vm1, %v801_v26, %v793_v23 }
  0xb1   : > { %2312 = vmatmul.msk.f32.vlgmr.msra.gmra.mxu1 %vm814_vm2, %v806_v27 }
  0xb8   : > { %2311 = vmatmul.msk.f32.gmra.mxu0 %vm814_vm2, %v805_v30 }
 0x125   : > { %v844_v33 = vpop.f32.mrf.mxu0 }
 0x126   : > { %v845_v34 = vadd.f32 %v2468_v32, %v844_v33 }
 0x128   : > { %vm856_vm3 = vcmp.gt.f32.partialorder %v845_v34, 0.0  ;;  %v860_v35 = vmul.f32 0.2, %v845_v34 }
 0x12a   : > { %v864_v36 = vsel %vm856_vm3, %v845_v34, %v860_v35 }
 0x12b   : > { %868 = vst.msk [vmem:[#allocation2 + $0x8] sm:$0xff] %vm751_vm0, %v864_v36 }
 0x12d   : > { %v847_v37 = vpop.f32.mrf.mxu0 }
 0x12e   : > { %v848_v38 = vadd.f32 %v2468_v32, %v847_v37  ;;  %v853_v39 = vpop.f32.mrf.mxu1 }
 0x12f   : > { %v854_v40 = vadd.f32 %v2468_v32, %v853_v39 }
 0x130   : > { %vm857_vm4 = vcmp.gt.f32.partialorder %v848_v38, 0.0  ;;  %v861_v41 = vmul.f32 0.2, %v848_v38 }
 0x131   : > { %vm859_vm5 = vcmp.gt.f32.partialorder %v854_v40, 0.0  ;;  %v863_v42 = vmul.f32 0.2, %v854_v40 }
 0x132   : > { %v865_v43 = vsel %vm857_vm4, %v848_v38, %v861_v41  ;;  %v872_v44 = vld [vmem:[#allocation2 + $0x8] sm:$0xff] }
 0x133   : > { %869 = vst.msk [vmem:[#allocation2 + $0x10] sm:$0xff] %vm751_vm0, %v865_v43  ;;  %888 = vrot.lane.b32.xlu2 %v872_v44, %s3425_s27  ;;  %v867_v45 = vsel %vm859_vm5, %v854_v40, %v863_v42  ;;  %v876_v61 = vld [vmem:[#allocation2 + $0x7] sm:$0xff] }
 0x134   : > { %871 = vst.msk [vmem:[#allocation2 + $0x20] sm:$0xff] %vm751_vm0, %v867_v45  ;;  %v2319_v42 = vld [vmem:[%s3462_s0 + $0x28] sm:$0xff]  ;;  %v2318_v43 = vld [vmem:[%s3462_s0 + $0x20] sm:$0xff] }
 0x135   : > { %v850_v46 = vpop.f32.mrf.mxu0  ;;  %1074 = vmatpush.msra.mxu2 %v2319_v42 }
 0x136   : > { %v851_v47 = vadd.f32 %v2468_v32, %v850_v46 }
 0x137   : > { %1075 = vmatpush.msra.mxu2 %v2318_v43 }
 0x138   : > { %vm858_vm6 = vcmp.gt.f32.partialorder %v851_v47, 0.0  ;;  %v862_v48 = vmul.f32 0.2, %v851_v47 }
 0x13a   : > { %v866_v49 = vsel %vm858_vm6, %v851_v47, %v862_v48  ;;  %v873_v50 = vld [vmem:[#allocation2 + $0x10] sm:$0xff]  ;;  %vm1132_vm6 = vcmask 277504  }
 0x13b   : > { %v880_v51 = vld [vmem:[#allocation2 + $0x9] sm:$0xff]  ;;  %870 = vst.msk [vmem:[#allocation2 + $0x18] sm:$0xff] %vm751_vm0, %v866_v49  ;;  %890 = vrot.lane.b32.xlu1 %v873_v50, %s3425_s27  ;;  %v883_v55 = vld [vmem:[#allocation2 + $0x21] sm:$0xff] }
 0x13c   : > { %904 = vrot.lane.b32.xlu0 %v880_v51, %s3427_s3  ;;  %v875_v56 = vld [vmem:[#allocation2 + $0x20] sm:$0xff]  ;;  %v877_v2 = vld [vmem:[#allocation2 + $0xf] sm:$0xff] }
 0x142   : > { %v882_v52 = vld [vmem:[#allocation2 + $0x19] sm:$0xff]  ;;  %v881_v54 = vld [vmem:[#allocation2 + $0x11] sm:$0xff] }
 0x143   : > { %v874_v53 = vld [vmem:[#allocation2 + $0x18] sm:$0xff]  ;;  %908 = vrot.lane.b32.xlu1 %v882_v52, %s3427_s3  ;;  %906 = vrot.lane.b32.xlu2 %v881_v54, %s3427_s3 }
 0x144   : > { %892 = vrot.lane.b32.xlu0 %v874_v53, %s3425_s27  ;;  %v878_v7 = vld [vmem:[#allocation2 + $0x17] sm:$0xff]  ;;  %v879_v13 = vld [vmem:[#allocation2 + $0x1f] sm:$0xff] }
 0x14b   : > { %894 = vrot.lane.b32.xlu2 %v875_v56, %s3425_s27 }
 0x14c   : > { %910 = vrot.lane.b32.xlu0 %v883_v55, %s3427_s3 }
 0x18d   : > { %v889_v60 = vpop.permute.xlu2 %888 }
 0x18e   : > { %v916_v62 = vsel %vm751_vm0, %v876_v61, %v889_v60 }
 0x19d   : > { %v907_v4 = vpop.permute.xlu2 %906 }
 0x1a5   : > { %v895_v11 = vpop.permute.xlu2 %894 }
 0x1a6   : > { %v919_v14 = vsel %vm751_vm0, %v879_v13, %v895_v11 }
 0x1ad   : > { %v891_v1 = vpop.permute.xlu1 %890 }
 0x1ae   : > { %v905_v63 = vpop.permute.xlu0 %904  ;;  %v917_v3 = vsel %vm751_vm0, %v877_v2, %v891_v1  ;;  %v2470_v1 = vld [vmem:[%s3463_s2 + $0x1] ss:$0 sm:$0xff]  ;;  %s3431_s2 = smov 24  }
 0x1af   : > { %v920_v0 = vsel %vm802_vm1, %v916_v62, %v905_v63  ;;  %v921_v5 = vsel %vm802_vm1, %v917_v3, %v907_v4 }
 0x1b0   : > { %2313 = vmatmul.msk.f32.vlgmr.msrb.gmra.mxu1 %vm814_vm2, %v920_v0 }
 0x1b5   : > { %v909_v8 = vpop.permute.xlu1 %908 }
 0x1b6   : > { %v893_v6 = vpop.permute.xlu0 %892 }
 0x1b7   : > { %v918_v9 = vsel %vm751_vm0, %v878_v7, %v893_v6 }
 0x1b8   : > { %2314 = vmatmul.msk.f32.gmra.mxu1 %vm814_vm2, %v921_v5  ;;  %v922_v10 = vsel %vm802_vm1, %v918_v9, %v909_v8 }
 0x1be   : > { %v911_v12 = vpop.permute.xlu0 %910 }
 0x1bf   : > { %v923_v15 = vsel %vm802_vm1, %v919_v14, %v911_v12 }
 0x1c0   : > { %2315 = vmatmul.msk.f32.gmra.mxu1 %vm814_vm2, %v922_v10 }
 0x1c8   : > { %2316 = vmatmul.msk.f32.gmra.mxu1 %vm814_vm2, %v923_v15 }
 0x22d   : > { %v960_v17 = vpop.f32.mrf.mxu1 }
 0x22e   : > { %v961_v18 = vadd.f32 %v2469_v16, %v960_v17 }
 0x230   : > { %v972_v19 = vadd.f32 %v961_v18, %v872_v44  ;;  %v2317_v44 = vld [vmem:[%s3462_s0 + $0x18] sm:$0xff]  ;;  %s3466_s0 = smov 16  }
 0x231   : > { %1076 = vmatpush.msra.mxu2 %v2317_v44 }
 0x232   : > { %vm976_vm7 = vcmp.gt.f32.partialorder %v972_v19, 0.0  ;;  %v980_v20 = vmul.f32 0.2, %v972_v19 }
 0x234   : > { %v2884_v21 = vsel %vm976_vm7, %v972_v19, %v980_v20 }
 0x235   : > { %1004 = vrot.lane.b32.xlu1 %v2884_v21, %s3425_s27  ;;  %988 = vst.msk [vmem:[#allocation2 + $0x8] sm:$0xff] %vm751_vm0, %v2884_v21  ;;  %v963_v22 = vpop.f32.mrf.mxu1 }
 0x236   : > { %v964_v23 = vadd.f32 %v2469_v16, %v963_v22 }
 0x238   : > { %v973_v24 = vadd.f32 %v964_v23, %v873_v50 }
 0x23a   : > { %vm977_vm8 = vcmp.gt.f32.partialorder %v973_v24, 0.0  ;;  %v981_v25 = vmul.f32 0.2, %v973_v24 }
 0x23c   : > { %v2890_v26 = vsel %vm977_vm8, %v973_v24, %v981_v25  ;;  %v992_v46 = vld [vmem:[#allocation2 + $0x7] sm:$0xff] }
 0x23d   : > { %v966_v27 = vpop.f32.mrf.mxu1  ;;  %1006 = vrot.lane.b32.xlu0 %v2890_v26, %s3425_s27  ;;  %989 = vst.msk [vmem:[#allocation2 + $0x10] sm:$0xff] %vm751_vm0, %v2890_v26 }
 0x23e   : > { %v967_v28 = vadd.f32 %v2469_v16, %v966_v27 }
 0x240   : > { %v974_v29 = vadd.f32 %v967_v28, %v874_v53 }
 0x242   : > { %vm978_vm9 = vcmp.gt.f32.partialorder %v974_v29, 0.0  ;;  %v982_v30 = vmul.f32 0.2, %v974_v29 }
 0x244   : > { %v2896_v32 = vsel %vm978_vm9, %v974_v29, %v982_v30  ;;  %v996_v33 = vld [vmem:[#allocation2 + $0x9] sm:$0xff] }
 0x245   : > { %990 = vst.msk [vmem:[#allocation2 + $0x18] sm:$0xff] %vm751_vm0, %v2896_v32  ;;  %1020 = vrot.lane.b32.xlu2 %v996_v33, %s3427_s3  ;;  %v969_v34 = vpop.f32.mrf.mxu1  ;;  %v993_v51 = vld [vmem:[#allocation2 + $0xf] sm:$0xff] }
 0x246   : > { %v970_v35 = vadd.f32 %v2469_v16, %v969_v34 }
 0x248   : > { %v975_v36 = vadd.f32 %v970_v35, %v875_v56 }
 0x24a   : > { %vm979_vm10 = vcmp.gt.f32.partialorder %v975_v36, 0.0  ;;  %v983_v37 = vmul.f32 0.2, %v975_v36 }
 0x24c   : > { %v997_v38 = vld [vmem:[#allocation2 + $0x11] sm:$0xff]  ;;  %v2901_v39 = vsel %vm979_vm10, %v975_v36, %v983_v37 }
 0x24d   : > { %1022 = vrot.lane.b32.xlu1 %v997_v38, %s3427_s3  ;;  %1008 = vrot.lane.b32.xlu2 %v2896_v32, %s3425_s27  ;;  %991 = vst.msk [vmem:[#allocation2 + $0x20] sm:$0xff] %vm751_vm0, %v2901_v39  ;;  %v994_v56 = vld [vmem:[#allocation2 + $0x17] sm:$0xff] }
 0x254   : > { %v999_v40 = vld [vmem:[#allocation2 + $0x21] sm:$0xff]  ;;  %v998_v41 = vld [vmem:[#allocation2 + $0x19] sm:$0xff] }
 0x255   : > { %1010 = vrot.lane.b32.xlu1 %v2901_v39, %s3425_s27  ;;  %1026 = vrot.lane.b32.xlu2 %v999_v40, %s3427_s3  ;;  %v995_v61 = vld [vmem:[#allocation2 + $0x1f] sm:$0xff] }
 0x256   : > { %1024 = vrot.lane.b32.xlu0 %v998_v41, %s3427_s3  ;;  %s3469_s3 = sld [smem:[#allocation25_spill]] }
 0x29f   : > { %v1021_v47 = vpop.permute.xlu2 %1020 }
 0x2a7   : > { %v1005_v45 = vpop.permute.xlu1 %1004  ;;  %v1009_v55 = vpop.permute.xlu2 %1008 }
 0x2a8   : > { %v1032_v48 = vsel %vm751_vm0, %v992_v46, %v1005_v45  ;;  %v1034_v57 = vsel %vm751_vm0, %v994_v56, %v1009_v55 }
 0x2a9   : > { %v1036_v49 = vsel %vm802_vm1, %v1032_v48, %v1021_v47  ;;  %v1310_v48 = vld [vmem:[%s3464_s24 + $0x18] sm:$0xff]  ;;  %s2407_s24 = sshll.u32 %s2784_s29, 4  ;;  %s3471_s29 = smov 24  }
 0x2aa   : > { %2321 = vmatmul.msk.f32.vlgmr.msra.gmra.mxu2 %vm814_vm2, %v1036_v49  ;;  %v1309_v49 = vld [vmem:[%s3465_s1 + $0x10] sm:$0xff] }
 0x2ab   : > { %1334 = vmatpush.msrb.mxu2 %v1310_v48 }
 0x2ad   : > { %1335 = vmatpush.msrb.mxu2 %v1309_v49 }
 0x2af   : > { %v1007_v50 = vpop.permute.xlu0 %1006  ;;  %v1027_v63 = vpop.permute.xlu2 %1026 }
 0x2b0   : > { %v1033_v52 = vsel %vm751_vm0, %v993_v51, %v1007_v50  ;;  %v1308_v51 = vld [vmem:[%s3465_s1 + $0x8] sm:$0xff] }
 0x2b1   : > { %1336 = vmatpush.msrb.mxu2 %v1308_v51 }
 0x2bf   : > { %v1023_v53 = vpop.permute.xlu1 %1022 }
 0x2c0   : > { %v1037_v54 = vsel %vm802_vm1, %v1033_v52, %v1023_v53 }
 0x2c1   : > { %2322 = vmatmul.msk.f32.gmra.mxu2 %vm814_vm2, %v1037_v54 }
 0x2c7   : > { %v1011_v60 = vpop.permute.xlu1 %1010 }
 0x2c8   : > { %v1025_v58 = vpop.permute.xlu0 %1024  ;;  %v1035_v62 = vsel %vm751_vm0, %v995_v61, %v1011_v60 }
 0x2c9   : > { %v1038_v59 = vsel %vm802_vm1, %v1034_v57, %v1025_v58  ;;  %v1039_v0 = vsel %vm802_vm1, %v1035_v62, %v1027_v63 }
 0x2ca   : > { %2323 = vmatmul.msk.f32.gmra.mxu2 %vm814_vm2, %v1038_v59  ;;  %v1307_v59 = vld [vmem:[%s3465_s1] sm:$0xff]  ;;  %s3433_s1 = smov 32  }
 0x2cb   : > { %1337 = vmatpush.msrb.mxu2 %v1307_v59 }
 0x2d2   : > { %2324 = vmatmul.msk.f32.gmra.mxu2 %vm814_vm2, %v1039_v0 }
 0x32d   : > { %v1078_v2 = vpop.f32.mrf.mxu2 }
 0x32e   : > { %v1079_v3 = vadd.f32 %v2470_v1, %v1078_v2 }
 0x330   : > { %v1090_v4 = vadd.f32 %v1079_v3, %v2884_v21  ;;  %v1119_v21 = vlaneseq }
 0x332   : > { %vm1094_vm11 = vcmp.gt.f32.partialorder %v1090_v4, 0.0  ;;  %v1098_v5 = vmul.f32 0.2, %v1090_v4  ;;  %v1120_v23 = vshrl.u32 %v1119_v21, 7 }
 0x334   : > { %v1102_v6 = vsel %vm1094_vm11, %v1090_v4, %v1098_v5  ;;  %v1124_v24 = vmul.u32 2, %v1120_v23  ;;  %v1121_v30 = vadd.s32 8, %v1120_v23  ;;  %v1381_v23 = vld [vmem:[%s3469_s3] sm:$0xff] }
 0x335   : > { %1106 = vst.msk [vmem:[#allocation2 + $0x8] sm:$0xff] %vm751_vm0, %v1102_v6 }
 0x336   : > { %1110 = vst.msk [vmem:[%s745_s28] sm:$0xff] %vm751_vm0, %v1102_v6  ;;  %v1203_v27 = vadd.s32 2, %v1124_v24  ;;  %v1240_v29 = vadd.s32 3, %v1124_v24  ;;  %v1125_v35 = vmul.u32 2, %v1121_v30  ;;  %v1166_v42 = vadd.s32 1, %v1124_v24 }
 0x338   : > { %v1204_v38 = vadd.s32 2, %v1125_v35  ;;  %v1241_v40 = vadd.s32 3, %v1125_v35  ;;  %v1167_v46 = vadd.s32 1, %v1125_v35 }
 0x33c   : > { %v1114_v36 = vld [vmem:[#allocation2 + $0x7] sm:$0xff] }
 0x344   : > { %v1081_v7 = vpop.f32.mrf.mxu2 }
 0x345   : > { %v1082_v8 = vadd.f32 %v2470_v1, %v1081_v7 }
 0x347   : > { %v1091_v9 = vadd.f32 %v1082_v8, %v2890_v26  ;;  %v1123_v26 = vand.u32 127, %v1119_v21  ;;  %v2471_v8 = vld [vmem:[%s3468_s26] ss:$0 sm:$0xff]  ;;  %v1383_v21 = vld [vmem:[%s3469_s3 + $0x10] sm:$0xff] }
 0x349   : > { %vm1095_vm12 = vcmp.gt.f32.partialorder %v1091_v9, 0.0  ;;  %v1099_v10 = vmul.f32 0.2, %v1091_v9  ;;  %vm1126_vm3 = vcmp.eq.s32.totalorder %v1123_v26, %v1124_v24  ;;  %vm1205_vm4 = vcmp.eq.s32.totalorder %v1123_v26, %v1203_v27 }
 0x34a   : > { %vm1242_vm5 = vcmp.eq.s32.totalorder %v1123_v26, %v1240_v29  ;;  %v2956_v34 = vsel %vm1126_vm3, 1.0, %v2607_v31  ;;  %v2959_v37 = vsel %vm1205_vm4, 1.0, %v2607_v31  ;;  %vm1127_vm7 = vcmp.eq.s32.totalorder %v1123_v26, %v1125_v35 }
 0x34b   : > { %v1103_v11 = vsel %vm1095_vm12, %v1091_v9, %v1099_v10  ;;  %vm1206_vm8 = vcmp.eq.s32.totalorder %v1123_v26, %v1204_v38  ;;  %vm1243_vm9 = vcmp.eq.s32.totalorder %v1123_v26, %v1241_v40  ;;  %v2326_v41 = vsel %vm1127_vm7, 1.0, %v2607_v31 }
 0x34c   : > { %1111 = vst.msk [vmem:[%s745_s28 + $0x8] sm:$0xff] %vm751_vm0, %v1103_v11  ;;  %v2336_v43 = vsel %vm1206_vm8, 1.0, %v2607_v31  ;;  %v2341_v44 = vsel %vm1243_vm9, 1.0, %v2607_v31  ;;  %vm1168_vm10 = vcmp.eq.s32.totalorder %v1123_v26, %v1166_v42  ;;  %vm1169_vm11 = vcmp.eq.s32.totalorder %v1123_v26, %v1167_v46 }
 0x34d   : > { %1107 = vst.msk [vmem:[#allocation2 + $0x10] sm:$0xff] %vm751_vm0, %v1103_v11  ;;  %v1084_v12 = vpop.f32.mrf.mxu2  ;;  %v2978_v45 = vsel %vm1168_vm10, 1.0, %v2607_v31  ;;  %v2331_v47 = vsel %vm1169_vm11, 1.0, %v2607_v31  ;;  %vm1315_vm12 = vcmask 261120   ;;  %vm1504_vm7 = vcmask 146432  }
 0x34e   : > { %v1085_v13 = vadd.f32 %v2470_v1, %v1084_v12  ;;  %1901 = vst.msk [vmem:[#allocation5] sm:$0xff] %vm1315_vm12, %v2607_v31  ;;  %vm1755_vm10 = vcmask 80896   ;;  %vm1902_vm11 = vcmask 257024  }
 0x34f   : > { %1903 = vst.msk [vmem:[#allocation5 + $0xc] sm:$0xf] %vm1902_vm11, %v2607_v31 }
 0x350   : > { %v1092_v14 = vadd.f32 %v1085_v13, %v2896_v32 }
 0x352   : > { %vm1096_vm13 = vcmp.gt.f32.partialorder %v1092_v14, 0.0  ;;  %v1100_v15 = vmul.f32 0.2, %v1092_v14 }
 0x354   : > { %v1104_v16 = vsel %vm1096_vm13, %v1092_v14, %v1100_v15  ;;  %v1115_v33 = vld [vmem:[#allocation2 + $0xf] sm:$0xff] }
 0x355   : > { %1112 = vst.msk [vmem:[%s745_s28 + $0x10] sm:$0xff] %vm751_vm0, %v1104_v16  ;;  %v1087_v17 = vpop.f32.mrf.mxu2 }
 0x356   : > { %1108 = vst.msk [vmem:[#allocation2 + $0x18] sm:$0xff] %vm751_vm0, %v1104_v16  ;;  %v1088_v18 = vadd.f32 %v2470_v1, %v1087_v17 }
 0x358   : > { %v1093_v19 = vadd.f32 %v1088_v18, %v2901_v39  ;;  %v2962_v39 = vsel %vm1242_vm5, 1.0, %v2607_v31  ;;  %v1925_v31 = vld [vmem:[%s3404_s15 + $0x38] sm:$0xff] }
 0x35a   : > { %vm1097_vm14 = vcmp.gt.f32.partialorder %v1093_v19, 0.0  ;;  %v1101_v20 = vmul.f32 0.2, %v1093_v19 }
 0x35c   : > { %v1105_v22 = vsel %vm1097_vm14, %v1093_v19, %v1101_v20 }
 0x35d   : > { %1109 = vst.msk [vmem:[#allocation2 + $0x20] sm:$0xff] %vm751_vm0, %v1105_v22  ;;  %v1116_v32 = vld [vmem:[#allocation2 + $0x17] sm:$0xff] }
 0x35e   : > { %1113 = vst.msk [vmem:[%s745_s28 + $0x18] sm:$0xff] %vm751_vm0, %v1105_v22  ;;  %v1382_v22 = vld [vmem:[%s3469_s3 + $0x8] sm:$0xff]  ;;  %s750_s28 = scalar_lea.vmem %s3409_s20, %s2407_s24 }
 0x364   : > { %v1118_v25 = vld [vmem:[#allocation2 + $0x27] sm:$0x3]  ;;  %v1117_v28 = vld [vmem:[#allocation2 + $0x1f] sm:$0xff] }
 0x365   : > { %2327 = vmatpush.msk.msra.mxu3 %vm1139_vm15, %v1118_v25  ;;  %2337 = vmatpush.msk.msrb.mxu0 %vm1139_vm15, %v1118_v25 }
 0x366   : > { %2342 = vmatpush.msk.msra.mxu1 %vm1139_vm15, %v1118_v25 }
 0x367   : > { %1155 = vmatpush.msra.mxu3 %v1117_v28  ;;  %1229 = vmatpush.msrb.mxu0 %v1117_v28 }
 0x368   : > { %1266 = vmatpush.msra.mxu1 %v1117_v28 }
 0x369   : > { %1156 = vmatpush.msra.mxu3 %v1116_v32  ;;  %1230 = vmatpush.msrb.mxu0 %v1116_v32 }
 0x36a   : > { %1267 = vmatpush.msra.mxu1 %v1116_v32 }
 0x36b   : > { %1157 = vmatpush.msra.mxu3 %v1115_v33  ;;  %1231 = vmatpush.msrb.mxu0 %v1115_v33 }
 0x36c   : > { %1268 = vmatpush.msra.mxu1 %v1115_v33 }
 0x36d   : > { %1158 = vmatpush.msra.mxu3 %v1114_v36  ;;  %1232 = vmatpush.msrb.mxu0 %v1114_v36 }
 0x36e   : > { %1269 = vmatpush.msra.mxu1 %v1114_v36  ;;  %2328 = vmatmul.msk.f32.vlgmr.msra.gmra.mxu3 %vm1132_vm6, %v2956_v34 }
 0x36f   : > { %2332 = vmatpush.msk.msrb.mxu3 %vm1139_vm15, %v1118_v25  ;;  %2338 = vmatmul.msk.f32.vlgmr.msrb.gmra.mxu0 %vm1132_vm6, %v2959_v37 }
 0x370   : > { %2343 = vmatmul.msk.f32.vlgmr.msra.gmra.mxu1 %vm1132_vm6, %v2962_v39 }
 0x371   : > { %1192 = vmatpush.msrb.mxu3 %v1117_v28 }
 0x373   : > { %1193 = vmatpush.msrb.mxu3 %v1116_v32 }
 0x375   : > { %1194 = vmatpush.msrb.mxu3 %v1115_v33 }
 0x376   : > { %2329 = vmatmul.msk.f32.gmra.mxu3 %vm1132_vm6, %v2326_v41 }
 0x377   : > { %1195 = vmatpush.msrb.mxu3 %v1114_v36  ;;  %2339 = vmatmul.msk.f32.gmra.mxu0 %vm1132_vm6, %v2336_v43  ;;  %v2472_v36 = vld [vmem:[%s3470_s8] ss:$0 sm:$0xff] }
 0x378   : > { %2344 = vmatmul.msk.f32.gmra.mxu1 %vm1132_vm6, %v2341_v44 }
 0x379   : > { %1407 = vmatpush.msra.mxu3 %v1383_v21  ;;  %v1612_v21 = vld [vmem:[%s3472_s9 + $0x8] sm:$0xff] }
 0x37b   : > { %1408 = vmatpush.msra.mxu3 %v1382_v22  ;;  %v1611_v22 = vld [vmem:[%s3472_s9] sm:$0xff] }
 0x37d   : > { %1409 = vmatpush.msra.mxu3 %v1381_v23 }
 0x37e   : > { %2333 = vmatmul.msk.f32.vlgmr.msrb.gmra.mxu3 %vm1132_vm6, %v2978_v45 }
 0x386   : > { %2334 = vmatmul.msk.f32.gmra.mxu3 %vm1132_vm6, %v2331_v47 }
 0x3ec   : > { %v1234_v50 = vpop.f32.mrf.mxu0 }
 0x3ed   : > { %1287 = vrot.lane.b32.xlu1 %v1234_v50, %s3466_s0  ;;  %v1271_v52 = vpop.f32.mrf.mxu1 }
 0x3ee   : > { %1295 = vrot.lane.b32.xlu2 %v1271_v52, %s3431_s2  ;;  %v2351_v52 = vld [vmem:[%s3469_s3 + $0x28] sm:$0xff] }
 0x3ef   : > { %1479 = vmatpush.msra.mxu0 %v2351_v52  ;;  %v2475_v52 = vld [vmem:[%s3475_s12] ss:$0 sm:$0xff] }
 0x3f1   : > { %v1160_v53 = vpop.f32.mrf.mxu3 }
 0x3f4   : > { %v1237_v54 = vpop.f32.mrf.mxu0 }
 0x3f5   : > { %1289 = vrot.lane.b32.xlu1 %v1237_v54, %s3466_s0  ;;  %v1274_v55 = vpop.f32.mrf.mxu1  ;;  %v2349_v54 = vld [vmem:[%s3469_s3 + $0x18] sm:$0xff] }
 0x3f6   : > { %1297 = vrot.lane.b32.xlu2 %v1274_v55, %s3431_s2 }
 0x3f9   : > { %v1163_v56 = vpop.f32.mrf.mxu3 }
 0x401   : > { %v1197_v57 = vpop.f32.mrf.mxu3 }
 0x402   : > { %1279 = vrot.lane.b32.xlu0 %v1197_v57, %s3467_s6 }
 0x409   : > { %v1200_v58 = vpop.f32.mrf.mxu3 }
 0x40a   : > { %1281 = vrot.lane.b32.xlu0 %v1200_v58, %s3467_s6 }
 0x448   : > { %v1296_v61 = vpop.permute.xlu2 %1295 }
 0x450   : > { %v1298_v4 = vpop.permute.xlu2 %1297 }
 0x45f   : > { %v1288_v60 = vpop.permute.xlu1 %1287 }
 0x467   : > { %v1290_v2 = vpop.permute.xlu1 %1289 }
 0x474   : > { %v1280_v62 = vpop.permute.xlu0 %1279 }
 0x475   : > { %v1301_v63 = vsel %vm751_vm0, %v1160_v53, %v1280_v62  ;;  %v2350_v53 = vld [vmem:[%s3469_s3 + $0x20] sm:$0xff]  ;;  %s2610_s3 = smov 48  }
 0x476   : > { %v1303_v0 = vsel %vm802_vm1, %v1301_v63, %v1288_v60  ;;  %1480 = vmatpush.msra.mxu0 %v2350_v53 }
 0x477   : > { %v1305_v1 = vsel %vm814_vm2, %v1303_v0, %v1296_v61 }
 0x478   : > { %2345 = vmatmul.msk.f32.vlgmr.msrb.gmra.mxu2 %vm1315_vm12, %v1305_v1  ;;  %1481 = vmatpush.msra.mxu0 %v2349_v54  ;;  %v2473_v1 = vld [vmem:[%s3470_s8 + $0x1] ss:$0 sm:$0xff]  ;;  %s3156_s8 = sand.u32 1, %s2595_s30  }
 0x479   : > { %s2301_s27 = sshll.u32 %s3156_s8, 3  ;;  %s3437_s26 = sshll.u32 %s3156_s8, 2 }
 0x47a   : > { %s3160_s4 = scalar_lea.vmem [#allocation6], %s2301_s27 }
 0x47c   : > { %v1282_v3 = vpop.permute.xlu0 %1281 }
 0x47d   : > { %v1302_v5 = vsel %vm751_vm0, %v1163_v56, %v1282_v3 }
 0x47e   : > { %v1304_v6 = vsel %vm802_vm1, %v1302_v5, %v1290_v2 }
 0x47f   : > { %v1306_v7 = vsel %vm814_vm2, %v1304_v6, %v1298_v4 }
 0x480   : > { %2346 = vmatmul.msk.f32.gmra.mxu2 %vm1315_vm12, %v1306_v7 }
 0x4fb   : > { %v1339_v9 = vpop.f32.mrf.mxu2 }
 0x4fc   : > { %v1340_v10 = vadd.f32 %v2471_v8, %v1339_v9 }
 0x4fe   : > { %vm1345_vm13 = vcmp.gt.f32.partialorder %v1340_v10, 0.0  ;;  %v1347_v11 = vmul.f32 0.2, %v1340_v10 }
 0x500   : > { %v1349_v12 = vsel %vm1345_vm13, %v1340_v10, %v1347_v11  ;;  %vm1934_vm13 = vcmask 785408  }
 0x501   : > { %1353 = vst.msk [vmem:[#allocation3 + $0x8] sm:$0xff] %vm751_vm0, %v1349_v12 }
 0x503   : > { %v1342_v13 = vpop.f32.mrf.mxu2 }
 0x504   : > { %v1343_v14 = vadd.f32 %v2471_v8, %v1342_v13 }
 0x506   : > { %vm1346_vm14 = vcmp.gt.f32.partialorder %v1343_v14, 0.0  ;;  %v1348_v15 = vmul.f32 0.2, %v1343_v14 }
 0x508   : > { %v1350_v16 = vsel %vm1346_vm14, %v1343_v14, %v1348_v15  ;;  %v1355_v17 = vld [vmem:[#allocation3 + $0x8] sm:$0xff] }
 0x509   : > { %1354 = vst.msk [vmem:[#allocation3 + $0x10] sm:$0xff] %vm751_vm0, %v1350_v16  ;;  %1363 = vrot.lane.b32.xlu0 %v1355_v17, %s3467_s6  ;;  %v1357_v25 = vld [vmem:[#allocation3 + $0x7] sm:$0xff] }
 0x510   : > { %v1360_v18 = vld [vmem:[#allocation3 + $0x11] sm:$0xff]  ;;  %v1359_v19 = vld [vmem:[#allocation3 + $0x9] sm:$0xff] }
 0x511   : > { %v1356_v20 = vld [vmem:[#allocation3 + $0x10] sm:$0xff]  ;;  %1373 = vrot.lane.b32.xlu0 %v1360_v18, %s3466_s0  ;;  %1371 = vrot.lane.b32.xlu1 %v1359_v19, %s3466_s0  ;;  %v1614_v19 = vld [vmem:[%s3472_s9 + $0x18] sm:$0xff] }
 0x512   : > { %1365 = vrot.lane.b32.xlu2 %v1356_v20, %s3467_s6  ;;  %v1358_v32 = vld [vmem:[#allocation3 + $0xf] sm:$0xff] }
 0x56c   : > { %v1366_v29 = vpop.permute.xlu2 %1365 }
 0x56d   : > { %v1378_v33 = vsel %vm751_vm0, %v1358_v32, %v1366_v29  ;;  %v2474_v29 = vld [vmem:[%s3473_s10] ss:$0 sm:$0xff] }
 0x57b   : > { %v1364_v24 = vpop.permute.xlu0 %1363 }
 0x57c   : > { %v1377_v26 = vsel %vm751_vm0, %v1357_v25, %v1364_v24 }
 0x583   : > { %v1372_v27 = vpop.permute.xlu1 %1371  ;;  %v1374_v30 = vpop.permute.xlu0 %1373 }
 0x584   : > { %v1379_v28 = vsel %vm802_vm1, %v1377_v26, %v1372_v27  ;;  %v1380_v35 = vsel %vm802_vm1, %v1378_v33, %v1374_v30 }
 0x585   : > { %2347 = vmatmul.msk.f32.vlgmr.msra.gmra.mxu3 %vm814_vm2, %v1379_v28 }
 0x58d   : > { %2348 = vmatmul.msk.f32.gmra.mxu3 %vm814_vm2, %v1380_v35 }
 0x608   : > { %v1411_v38 = vpop.f32.mrf.mxu3 }
 0x609   : > { %v1412_v40 = vadd.f32 %v2472_v36, %v1411_v38 }
 0x60b   : > { %v1417_v41 = vadd.f32 %v1412_v40, %v1355_v17  ;;  %v1666_v40 = vld [vmem:[%s3474_s11 + $0x28] sm:$0xff] }
 0x60c   : > { %1685 = vmatpush.msrb.mxu0 %v1666_v40  ;;  %v2477_v40 = vld [vmem:[%s3403_s14] ss:$0 sm:$0xff] }
 0x60d   : > { %vm1419_vm3 = vcmp.gt.f32.partialorder %v1417_v41, 0.0  ;;  %v1421_v42 = vmul.f32 0.2, %v1417_v41 }
 0x60f   : > { %v1423_v43 = vsel %vm1419_vm3, %v1417_v41, %v1421_v42  ;;  %v1665_v41 = vld [vmem:[%s3474_s11 + $0x20] sm:$0xff]  ;;  %v1664_v42 = vld [vmem:[%s3474_s11 + $0x18] sm:$0xff] }
 0x610   : > { %1433 = vrot.lane.b32.xlu1 %v1423_v43, %s3467_s6  ;;  %1425 = vst.msk [vmem:[#allocation3 + $0x8] sm:$0xff] %vm751_vm0, %v1423_v43  ;;  %v1414_v44 = vpop.f32.mrf.mxu3  ;;  %1686 = vmatpush.msrb.mxu0 %v1665_v41  ;;  %v1920_v41 = vld [vmem:[%s3404_s15 + $0x10] sm:$0xff] }
 0x611   : > { %v1415_v46 = vadd.f32 %v2472_v36, %v1414_v44  ;;  %v1662_v44 = vld [vmem:[%s3474_s11 + $0x8] sm:$0xff] }
 0x612   : > { %1687 = vmatpush.msrb.mxu0 %v1664_v42 }
 0x613   : > { %v1418_v47 = vadd.f32 %v1415_v46, %v1356_v20  ;;  %v1613_v20 = vld [vmem:[%s3472_s9 + $0x10] sm:$0xff]  ;;  %v1661_v46 = vld [vmem:[%s3474_s11] sm:$0xff] }
 0x615   : > { %vm1420_vm4 = vcmp.gt.f32.partialorder %v1418_v47, 0.0  ;;  %v1422_v48 = vmul.f32 0.2, %v1418_v47 }
 0x617   : > { %v1424_v49 = vsel %vm1420_vm4, %v1418_v47, %v1422_v48  ;;  %v1427_v56 = vld [vmem:[#allocation3 + $0x7] sm:$0xff] }
 0x618   : > { %1435 = vrot.lane.b32.xlu0 %v1424_v49, %s3467_s6  ;;  %1426 = vst.msk [vmem:[#allocation3 + $0x10] sm:$0xff] %vm751_vm0, %v1424_v49 }
 0x61f   : > { %v1430_v50 = vld [vmem:[#allocation3 + $0x11] sm:$0xff]  ;;  %v1429_v51 = vld [vmem:[#allocation3 + $0x9] sm:$0xff] }
 0x620   : > { %1443 = vrot.lane.b32.xlu1 %v1430_v50, %s3466_s0  ;;  %1441 = vrot.lane.b32.xlu2 %v1429_v51, %s3466_s0  ;;  %v1428_v61 = vld [vmem:[#allocation3 + $0xf] sm:$0xff] }
 0x67a   : > { %v1442_v57 = vpop.permute.xlu2 %1441 }
 0x682   : > { %v1434_v55 = vpop.permute.xlu1 %1433 }
 0x683   : > { %v1447_v58 = vsel %vm751_vm0, %v1427_v56, %v1434_v55 }
 0x684   : > { %v1449_v59 = vsel %vm802_vm1, %v1447_v58, %v1442_v57 }
 0x685   : > { %2353 = vmatmul.msk.f32.vlgmr.msra.gmra.mxu0 %vm814_vm2, %v1449_v59  ;;  %v2370_v59 = vld [vmem:[%s3474_s11 + $0x58] sm:$0xff] }
 0x68a   : > { %v1436_v60 = vpop.permute.xlu0 %1435 }
 0x68b   : > { %v1448_v62 = vsel %vm751_vm0, %v1428_v61, %v1436_v60  ;;  %v2369_v60 = vld [vmem:[%s3474_s11 + $0x50] sm:$0xff]  ;;  %v2368_v61 = vld [vmem:[%s3474_s11 + $0x48] sm:$0xff] }
 0x692   : > { %v1444_v63 = vpop.permute.xlu1 %1443 }
 0x693   : > { %v1450_v0 = vsel %vm802_vm1, %v1448_v62, %v1444_v63  ;;  %v2367_v62 = vld [vmem:[%s3474_s11 + $0x40] sm:$0xff]  ;;  %v2366_v63 = vld [vmem:[%s3474_s11 + $0x38] sm:$0xff] }
 0x694   : > { %2354 = vmatmul.msk.f32.gmra.mxu0 %vm814_vm2, %v1450_v0  ;;  %v2365_v0 = vld [vmem:[%s3474_s11 + $0x30] sm:$0xff] }
 0x702   : > { %v1483_v2 = vpop.f32.mrf.mxu0 }
 0x703   : > { %v1484_v3 = vadd.f32 %v2473_v1, %v1483_v2 }
 0x705   : > { %v1489_v4 = vadd.f32 %v1484_v3, %v1423_v43  ;;  %v1663_v43 = vld [vmem:[%s3474_s11 + $0x10] sm:$0xff] }
 0x706   : > { %1688 = vmatpush.msrb.mxu0 %v1663_v43  ;;  %v1919_v43 = vld [vmem:[%s3404_s15 + $0x8] sm:$0xff] }
 0x707   : > { %vm1491_vm5 = vcmp.gt.f32.partialorder %v1489_v4, 0.0  ;;  %v1493_v5 = vmul.f32 0.2, %v1489_v4 }
 0x708   : > { %1689 = vmatpush.msrb.mxu0 %v1662_v44 }
 0x709   : > { %v1495_v6 = vsel %vm1491_vm5, %v1489_v4, %v1493_v5 }
 0x70a   : > { %1497 = vst.msk [vmem:[#allocation3 + $0x8] sm:$0xff] %vm751_vm0, %v1495_v6  ;;  %1690 = vmatpush.msrb.mxu0 %v1661_v46 }
 0x70b   : > { %1499 = vst.msk [vmem:[%s750_s28] sm:$0xff] %vm751_vm0, %v1495_v6  ;;  %v2476_v6 = vld [vmem:[%s3475_s12 + $0x1] ss:$0 sm:$0xff] }
 0x711   : > { %v1486_v7 = vpop.f32.mrf.mxu0  ;;  %v1501_v14 = vld [vmem:[#allocation3 + $0x7] sm:$0xff] }
 0x712   : > { %v1487_v8 = vadd.f32 %v2473_v1, %v1486_v7 }
 0x714   : > { %v1490_v9 = vadd.f32 %v1487_v8, %v1424_v49 }
 0x716   : > { %vm1492_vm6 = vcmp.gt.f32.partialorder %v1490_v9, 0.0  ;;  %v1494_v10 = vmul.f32 0.2, %v1490_v9 }
 0x718   : > { %v1496_v11 = vsel %vm1492_vm6, %v1490_v9, %v1494_v10 }
 0x719   : > { %1498 = vst.msk [vmem:[#allocation3 + $0x10] sm:$0xff] %vm751_vm0, %v1496_v11 }
 0x71a   : > { %1500 = vst.msk [vmem:[%s750_s28 + $0x8] sm:$0xff] %vm751_vm0, %v1496_v11  ;;  %s2070_s28 = sand.u32 1, %s2753_s5  }
 0x720   : > { %v1503_v12 = vld [vmem:[#allocation3 + $0x17] sm:$0x3]  ;;  %v1502_v13 = vld [vmem:[#allocation3 + $0xf] sm:$0xff] }
 0x721   : > { %2355 = vmatpush.msk.msrb.mxu1 %vm1139_vm15, %v1503_v12  ;;  %2357 = vmatpush.msk.msra.mxu2 %vm1139_vm15, %v1503_v12 }
 0x722   : > { %2359 = vmatpush.msk.msrb.mxu3 %vm1139_vm15, %v1503_v12 }
 0x723   : > { %1524 = vmatpush.msrb.mxu1 %v1502_v13  ;;  %1546 = vmatpush.msra.mxu2 %v1502_v13 }
 0x724   : > { %1568 = vmatpush.msrb.mxu3 %v1502_v13 }
 0x725   : > { %1525 = vmatpush.msrb.mxu1 %v1501_v14  ;;  %1547 = vmatpush.msra.mxu2 %v1501_v14 }
 0x726   : > { %1569 = vmatpush.msrb.mxu3 %v1501_v14  ;;  %2356 = vmatmul.msk.f32.vlgmr.msrb.gmra.mxu1 %vm1504_vm7, %v2956_v34 }
 0x727   : > { %2358 = vmatmul.msk.f32.vlgmr.msra.gmra.mxu2 %vm1504_vm7, %v2978_v45  ;;  %2360 = vmatmul.msk.f32.vlgmr.msrb.gmra.mxu3 %vm1504_vm7, %v2959_v37 }
 0x728   : > { %2361 = vmatpush.msk.msra.mxu1 %vm1139_vm15, %v1503_v12  ;;  %1634 = vmatpush.msrb.mxu2 %v1614_v19 }
 0x729   : > { %1737 = vmatpush.msra.mxu3 %v2370_v59 }
 0x72a   : > { %1590 = vmatpush.msra.mxu1 %v1502_v13  ;;  %1635 = vmatpush.msrb.mxu2 %v1613_v20  ;;  %v1863_v20 = vld [vmem:[%s3477_s13 + $0x8] sm:$0xff] }
 0x72b   : > { %1738 = vmatpush.msra.mxu3 %v2369_v60 }
 0x72c   : > { %1591 = vmatpush.msra.mxu1 %v1501_v14  ;;  %1636 = vmatpush.msrb.mxu2 %v1612_v21  ;;  %v1869_v14 = vld [vmem:[%s3477_s13 + $0x38] sm:$0xff]  ;;  %v1862_v21 = vld [vmem:[%s3477_s13] sm:$0xff] }
 0x72d   : > { %1739 = vmatpush.msra.mxu3 %v2368_v61 }
 0x72e   : > { %2362 = vmatmul.msk.f32.vlgmr.msra.gmra.mxu1 %vm1504_vm7, %v2962_v39  ;;  %1637 = vmatpush.msrb.mxu2 %v1611_v22 }
 0x72f   : > { %1740 = vmatpush.msra.mxu3 %v2367_v62 }
 0x731   : > { %1741 = vmatpush.msra.mxu3 %v2366_v63  ;;  %v2394_v63 = vld [vmem:[%s3404_s15 + $0xb8] sm:$0xff] }
 0x733   : > { %1742 = vmatpush.msra.mxu3 %v2365_v0  ;;  %v2393_v0 = vld [vmem:[%s3404_s15 + $0xb0] sm:$0xff] }
 0x7a3   : > { %v1527_v15 = vpop.f32.mrf.mxu1 }
 0x7aa   : > { %v1549_v16 = vpop.f32.mrf.mxu2  ;;  %v1571_v17 = vpop.f32.mrf.mxu3 }
 0x7ab   : > { %1601 = vrot.lane.b32.xlu0 %v1571_v17, %s3466_s0  ;;  %1597 = vrot.lane.b32.xlu2 %v1549_v16, %s3467_s6  ;;  %v1593_v18 = vpop.f32.mrf.mxu1 }
 0x7ac   : > { %1605 = vrot.lane.b32.xlu1 %v1593_v18, %s3471_s29  ;;  %s2611_s29 = smov 64  }
 0x805   : > { %v1598_v23 = vpop.permute.xlu2 %1597 }
 0x806   : > { %v1608_v24 = vsel %vm751_vm0, %v1527_v15, %v1598_v23  ;;  %vm1671_vm0 = vcmask 392192   ;;  %v1868_v15 = vld [vmem:[%s3477_s13 + $0x30] sm:$0xff] }
 0x81d   : > { %v1602_v25 = vpop.permute.xlu0 %1601 }
 0x81e   : > { %v1609_v26 = vsel %vm802_vm1, %v1608_v24, %v1602_v25  ;;  %v1606_v27 = vpop.permute.xlu1 %1605 }
 0x81f   : > { %v1610_v28 = vsel %vm814_vm2, %v1609_v26, %v1606_v27 }
 0x820   : > { %2363 = vmatmul.msk.f32.vlgmr.msrb.gmra.mxu2 %vm1315_vm12, %v1610_v28  ;;  %v1929_v28 = vld [vmem:[%s3404_s15 + $0x58] sm:$0xff] }
 0x821   : > { %1942 = vmatpush.msrb.mxu3 %v1929_v28 }
 0x8a3   : > { %v1639_v30 = vpop.f32.mrf.mxu2 }
 0x8a4   : > { %v1640_v32 = vadd.f32 %v2474_v29, %v1639_v30  ;;  %v1928_v29 = vld [vmem:[%s3404_s15 + $0x50] sm:$0xff]  ;;  %v1927_v30 = vld [vmem:[%s3404_s15 + $0x48] sm:$0xff] }
 0x8a5   : > { %1943 = vmatpush.msrb.mxu3 %v1928_v29 }
 0x8a6   : > { %vm1642_vm8 = vcmp.gt.f32.partialorder %v1640_v32, 0.0  ;;  %v1643_v33 = vmul.f32 0.2, %v1640_v32 }
 0x8a7   : > { %1944 = vmatpush.msrb.mxu3 %v1927_v30 }
 0x8a8   : > { %v1644_v35 = vsel %vm1642_vm8, %v1640_v32, %v1643_v33  ;;  %v1926_v32 = vld [vmem:[%s3404_s15 + $0x40] sm:$0xff]  ;;  %v1924_v33 = vld [vmem:[%s3404_s15 + $0x30] sm:$0xff] }
 0x8a9   : > { %1647 = vst.msk [vmem:[#allocation4 + $0x8] sm:$0xff] %vm802_vm1, %v1644_v35  ;;  %1945 = vmatpush.msrb.mxu3 %v1926_v32  ;;  %v1923_v35 = vld [vmem:[%s3404_s15 + $0x28] sm:$0xff] }
 0x8ab   : > { %1946 = vmatpush.msrb.mxu3 %v1925_v31 }
 0x8ad   : > { %1947 = vmatpush.msrb.mxu3 %v1924_v33 }
 0x8af   : > { %1948 = vmatpush.msrb.mxu3 %v1923_v35 }
 0x8b0   : > { %v1650_v36 = vld [vmem:[#allocation4 + $0x9] sm:$0xff] }
 0x8b1   : > { %v1648_v38 = vld [vmem:[#allocation4 + $0x8] sm:$0xff]  ;;  %1656 = vrot.lane.b32.xlu0 %v1650_v36, %s3433_s1  ;;  %s3476_s1 = smov 32   ;;  %v1922_v36 = vld [vmem:[%s3404_s15 + $0x20] sm:$0xff] }
 0x8b2   : > { %1652 = vrot.lane.b32.xlu2 %v1648_v38, %s3466_s0  ;;  %v1649_v48 = vld [vmem:[#allocation4 + $0x7] sm:$0xff]  ;;  %1949 = vmatpush.msrb.mxu3 %v1922_v36 }
 0x90c   : > { %v1653_v47 = vpop.permute.xlu2 %1652 }
 0x90d   : > { %v1659_v49 = vsel %vm802_vm1, %v1649_v48, %v1653_v47 }
 0x923   : > { %v1657_v50 = vpop.permute.xlu0 %1656 }
 0x924   : > { %v1660_v51 = vsel %vm1315_vm12, %v1659_v49, %v1657_v50  ;;  %v1918_v50 = vld [vmem:[%s3404_s15] sm:$0xff] }
 0x925   : > { %2364 = vmatmul.msk.f32.vlgmr.msrb.gmra.mxu0 %vm1671_vm0, %v1660_v51 }
 0x9a2   : > { %v1692_v53 = vpop.f32.mrf.mxu0 }
 0x9a3   : > { %v1693_v54 = vadd.f32 %v2475_v52, %v1692_v53 }
 0x9a5   : > { %v1695_v55 = vadd.f32 %v1693_v54, %v1648_v38  ;;  %v1921_v38 = vld [vmem:[%s3404_s15 + $0x18] sm:$0xff] }
 0x9a6   : > { %1950 = vmatpush.msrb.mxu3 %v1921_v38 }
 0x9a7   : > { %vm1696_vm2 = vcmp.gt.f32.partialorder %v1695_v55, 0.0  ;;  %v1697_v56 = vmul.f32 0.2, %v1695_v55 }
 0x9a8   : > { %1951 = vmatpush.msrb.mxu3 %v1920_v41 }
 0x9a9   : > { %v1698_v57 = vsel %vm1696_vm2, %v1695_v55, %v1697_v56  ;;  %v2478_v56 = vld [vmem:[%s3405_s16] ss:$0 sm:$0xff] }
 0x9aa   : > { %1703 = vrot.lane.b32.xlu1 %v1698_v57, %s3466_s0  ;;  %1699 = vst.msk [vmem:[#allocation4 + $0x8] sm:$0xff] %vm802_vm1, %v1698_v57  ;;  %1952 = vmatpush.msrb.mxu3 %v1919_v43 }
 0x9ac   : > { %1953 = vmatpush.msrb.mxu3 %v1918_v50 }
 0x9b1   : > { %v1701_v58 = vld [vmem:[#allocation4 + $0x9] sm:$0xff] }
 0x9b2   : > { %1707 = vrot.lane.b32.xlu2 %v1701_v58, %s3476_s1  ;;  %v1700_v2 = vld [vmem:[#allocation4 + $0x7] sm:$0xff] }
 0xa0c   : > { %v1708_v3 = vpop.permute.xlu2 %1707 }
 0xa1c   : > { %v1704_v1 = vpop.permute.xlu1 %1703 }
 0xa1d   : > { %v1710_v4 = vsel %vm802_vm1, %v1700_v2, %v1704_v1  ;;  %v2392_v1 = vld [vmem:[%s3404_s15 + $0xa8] sm:$0xff]  ;;  %v2391_v2 = vld [vmem:[%s3404_s15 + $0xa0] sm:$0xff] }
 0xa1e   : > { %v1711_v5 = vsel %vm1315_vm12, %v1710_v4, %v1708_v3  ;;  %v2390_v3 = vld [vmem:[%s3404_s15 + $0x98] sm:$0xff]  ;;  %v2389_v4 = vld [vmem:[%s3404_s15 + $0x90] sm:$0xff] }
 0xa1f   : > { %2372 = vmatmul.msk.f32.vlgmr.msra.gmra.mxu3 %vm1671_vm0, %v1711_v5  ;;  %v2388_v5 = vld [vmem:[%s3404_s15 + $0x88] sm:$0xff] }
 0xaa2   : > { %v1744_v7 = vpop.f32.mrf.mxu3 }
 0xaa3   : > { %v1745_v8 = vadd.f32 %v2476_v6, %v1744_v7  ;;  %v2387_v6 = vld [vmem:[%s3404_s15 + $0x80] sm:$0xff]  ;;  %v2386_v7 = vld [vmem:[%s3404_s15 + $0x78] sm:$0xff] }
 0xaa5   : > { %v1747_v9 = vadd.f32 %v1745_v8, %v1698_v57  ;;  %v2385_v8 = vld [vmem:[%s3404_s15 + $0x70] sm:$0xff] }
 0xaa7   : > { %vm1748_vm9 = vcmp.gt.f32.partialorder %v1747_v9, 0.0  ;;  %v1749_v10 = vmul.f32 0.2, %v1747_v9 }
 0xaa9   : > { %v1750_v11 = vsel %vm1748_vm9, %v1747_v9, %v1749_v10  ;;  %v2384_v9 = vld [vmem:[%s3404_s15 + $0x68] sm:$0xff]  ;;  %v2383_v10 = vld [vmem:[%s3404_s15 + $0x60] sm:$0xff] }
 0xaaa   : > { %1751 = vst.msk [vmem:[#allocation4 + $0x8] sm:$0xff] %vm802_vm1, %v1750_v11 }
 0xaab   : > { %1752 = vst.msk [vmem:[%s3160_s4] sm:$0xff] %vm802_vm1, %v1750_v11 }
 0xab1   : > { %v1754_v12 = vld [vmem:[#allocation4 + $0xf] sm:$0x3]  ;;  %v1753_v13 = vld [vmem:[#allocation4 + $0x7] sm:$0xff] }
 0xab2   : > { %2373 = vmatpush.msk.msrb.mxu1 %vm1139_vm15, %v1754_v12  ;;  %2375 = vmatpush.msk.msra.mxu2 %vm1139_vm15, %v1754_v12 }
 0xab3   : > { %2377 = vmatpush.msk.msra.mxu0 %vm1139_vm15, %v1754_v12 }
 0xab4   : > { %1776 = vmatpush.msrb.mxu1 %v1753_v13  ;;  %1798 = vmatpush.msra.mxu2 %v1753_v13 }
 0xab5   : > { %1820 = vmatpush.msra.mxu0 %v1753_v13  ;;  %2376 = vmatmul.msk.f32.vlgmr.msra.gmra.mxu2 %vm1755_vm10, %v2978_v45  ;;  %v1867_v45 = vld [vmem:[%s3477_s13 + $0x28] sm:$0xff] }
 0xab6   : > { %2379 = vmatpush.msk.msra.mxu1 %vm1139_vm15, %v1754_v12  ;;  %2378 = vmatmul.msk.f32.vlgmr.msra.gmra.mxu0 %vm1755_vm10, %v2959_v37  ;;  %v1865_v37 = vld [vmem:[%s3477_s13 + $0x18] sm:$0xff]  ;;  %vm1874_vm15 = vcmask 523264  }
 0xab7   : > { %2374 = vmatmul.msk.f32.vlgmr.msrb.gmra.mxu1 %vm1755_vm10, %v2956_v34  ;;  %1886 = vmatpush.msrb.mxu2 %v1869_v14  ;;  %v1866_v34 = vld [vmem:[%s3477_s13 + $0x20] sm:$0xff] }
 0xab8   : > { %1842 = vmatpush.msra.mxu1 %v1753_v13  ;;  %2000 = vmatpush.msrb.mxu0 %v2394_v63 }
 0xab9   : > { %1887 = vmatpush.msrb.mxu2 %v1868_v15 }
 0xaba   : > { %2001 = vmatpush.msrb.mxu0 %v2393_v0 }
 0xabb   : > { %1888 = vmatpush.msrb.mxu2 %v1867_v45  ;;  %v2025_v45 = vld [vmem:[%s3406_s17 + $0x18] sm:$0xff] }
 0xabc   : > { %2002 = vmatpush.msrb.mxu0 %v2392_v1  ;;  %2045 = vmatpush.msrb.mxu1 %v2025_v45 }
 0xabd   : > { %1889 = vmatpush.msrb.mxu2 %v1866_v34  ;;  %v2024_v34 = vld [vmem:[%s3406_s17 + $0x10] sm:$0xff] }
 0xabe   : > { %2003 = vmatpush.msrb.mxu0 %v2391_v2  ;;  %2046 = vmatpush.msrb.mxu1 %v2024_v34 }
 0xabf   : > { %2380 = vmatmul.msk.f32.vlgmr.msra.gmra.mxu1 %vm1755_vm10, %v2962_v39  ;;  %v1864_v39 = vld [vmem:[%s3477_s13 + $0x10] sm:$0xff]  ;;  %1890 = vmatpush.msrb.mxu2 %v1865_v37  ;;  %v2023_v37 = vld [vmem:[%s3406_s17 + $0x8] sm:$0xff] }
 0xac0   : > { %2004 = vmatpush.msrb.mxu0 %v2390_v3  ;;  %2047 = vmatpush.msrb.mxu1 %v2023_v37 }
 0xac1   : > { %1891 = vmatpush.msrb.mxu2 %v1864_v39  ;;  %v2022_v39 = vld [vmem:[%s3406_s17] sm:$0xff] }
 0xac2   : > { %2005 = vmatpush.msrb.mxu0 %v2389_v4  ;;  %2048 = vmatpush.msrb.mxu1 %v2022_v39 }
 0xac3   : > { %1892 = vmatpush.msrb.mxu2 %v1863_v20 }
 0xac4   : > { %2006 = vmatpush.msrb.mxu0 %v2388_v5 }
 0xac5   : > { %1893 = vmatpush.msrb.mxu2 %v1862_v21 }
 0xac6   : > { %2007 = vmatpush.msrb.mxu0 %v2387_v6 }
 0xac8   : > { %2008 = vmatpush.msrb.mxu0 %v2386_v7 }
 0xaca   : > { %2009 = vmatpush.msrb.mxu0 %v2385_v8 }
 0xacc   : > { %2010 = vmatpush.msrb.mxu0 %v2384_v9 }
 0xace   : > { %2011 = vmatpush.msrb.mxu0 %v2383_v10 }
 0xb33   : > { %v1822_v16 = vpop.f32.mrf.mxu0 }
 0xb34   : > { %1852 = vrot.lane.b32.xlu1 %v1822_v16, %s3476_s1  ;;  %v1778_v17 = vpop.f32.mrf.mxu1  ;;  %v2479_v16 = vld [vmem:[%s3405_s16 + $0x1] ss:$0 sm:$0xff] }
 0xb38   : > { %v1800_v18 = vpop.f32.mrf.mxu2 }
 0xb39   : > { %1848 = vrot.lane.b32.xlu0 %v1800_v18, %s3466_s0  ;;  %s728_s0 = scalar_lea.vmem [#allocation8], %s3437_s26  ;;  %s2501_s26 = scalar_lea.hbm %s3411_s22, 8 }
 0xb3a   : > { %s2108_s6 = sshll.u32 %s728_s0, 4  ;;  %s2109_s6 = int_to_ptr.vmem [resolvable:$true] %s2108_s6 }
 0xb3c   : > { %v1844_v19 = vpop.f32.mrf.mxu1 }
 0xb3d   : > { %1856 = vrot.lane.b32.xlu2 %v1844_v19, %s2610_s3  ;;  %s3436_s3 = sshll.u32 %s2753_s5, 2 }
 0xb3e   : > { %s2106_s10 = scalar_lea.hbm %s3411_s22, %s3436_s3 }
 0xb3f   : > { %s2110_s27 = sshll.u32 %s2106_s10, 4  ;;  %s2111_s27 = int_to_ptr.hbm [resolvable:$true] %s2110_s27 }
 0xb40   : > { %s2495_s24 = sshra.s32 %s2111_s27, 4  ;;  %s2496_s24 = int_to_ptr.hbm [resolvable:$true] %s2495_s24 }
 0xb41   : > { %s2497_s2 = scalar_lea.hbm %s2496_s24, 4  ;;  %p2502_p0 = scmp.lt.s32.totalorder %s2496_s24, %s3411_s22 }
 0xb42   : > { %p2498_p11 = scmp.ne.s32.totalorder %s2496_s24, %s2497_s2  ;;  %p2503_p1 = scmp.lt.s32.totalorder %s2501_s26, %s2497_s2 }
 0xb44   : > { %p2499_p12 = pnand %p2498_p11, %p2772_p5  ;;  %p2504_p2 = por %p2503_p1, %p2502_p0 }
 0xb46   : > { %p2500_p13 = pneg %p2499_p12 }
 0xb48   : > { %p2505_p3 = pnand %p2504_p2, %p2500_p13 }
 0xb97   : > { %v1857_v24 = vpop.permute.xlu2 %1856 }
 0xba6   : > { %v1853_v22 = vpop.permute.xlu1 %1852 }
 0xbab   : > { %v1849_v23 = vpop.permute.xlu0 %1848 }
 0xbac   : > { %v1859_v25 = vsel %vm802_vm1, %v1778_v17, %v1849_v23 }
 0xbad   : > { %v1860_v26 = vsel %vm1315_vm12, %v1859_v25, %v1853_v22 }
 0xbae   : > { %v1861_v27 = vsel %vm1671_vm0, %v1860_v26, %v1857_v24 }
 0xbaf   : > { %2381 = vmatmul.msk.f32.vlgmr.msrb.gmra.mxu2 %vm1874_vm15, %v1861_v27 }
 0xc32   : > { %v1895_v42 = vpop.f32.mrf.mxu2 }
 0xc33   : > { %v1896_v44 = vadd.f32 %v2477_v40, %v1895_v42 }
 0xc35   : > { %vm1898_vm1 = vcmp.gt.f32.partialorder %v1896_v44, 0.0  ;;  %v1899_v46 = vmul.f32 0.2, %v1896_v44 }
 0xc37   : > { %v1900_v47 = vsel %vm1898_vm1, %v1896_v44, %v1899_v46 }
 0xc38   : > { %1904 = vst.msk [vmem:[#allocation5 + $0x8] sm:$0xf] %vm1902_vm11, %v1900_v47 }
 0xc3f   : > { %v1907_v48 = vld [vmem:[#allocation5 + $0x9] sm:$0xf] }
 0xc40   : > { %v1905_v49 = vld [vmem:[#allocation5 + $0x8] sm:$0xf]  ;;  %1913 = vrot.lane.b32.xlu1 %v1907_v48, %s2611_s29 }
 0xc41   : > { %1909 = vrot.lane.b32.xlu0 %v1905_v49, %s3476_s1  ;;  %v1906_v52 = vld [vmem:[#allocation5 + $0x7] sm:$0xf] }
 0xcb2   : > { %v1914_v51 = vpop.permute.xlu1 %1913 }
 0xcb3   : > { %v1910_v53 = vpop.permute.xlu0 %1909 }
 0xcb4   : > { %v1916_v54 = vsel %vm1315_vm12, %v1906_v52, %v1910_v53 }
 0xcb5   : > { %v1917_v55 = vsel %vm1874_vm15, %v1916_v54, %v1914_v51 }
 0xcb6   : > { %2382 = vmatmul.msk.f32.vlgmr.msrb.gmra.mxu3 %vm1934_vm13, %v1917_v55 }
 0xd39   : > { %v1955_v57 = vpop.f32.mrf.mxu3 }
 0xd3a   : > { %v1956_v58 = vadd.f32 %v2478_v56, %v1955_v57 }
 0xd3c   : > { %v1958_v59 = vadd.f32 %v1956_v58, %v1905_v49 }
 0xd3e   : > { %vm1959_vm14 = vcmp.gt.f32.partialorder %v1958_v59, 0.0  ;;  %v1960_v60 = vmul.f32 0.2, %v1958_v59 }
 0xd40   : > { %v1961_v61 = vsel %vm1959_vm14, %v1958_v59, %v1960_v60 }
 0xd41   : > { %1966 = vrot.lane.b32.xlu2 %v1961_v61, %s3476_s1  ;;  %1962 = vst.msk [vmem:[#allocation5 + $0x8] sm:$0xf] %vm1902_vm11, %v1961_v61  ;;  %s2401_s1 = sshll.u32 %s2753_s5, 3 }
 0xd48   : > { %v1964_v62 = vld [vmem:[#allocation5 + $0x9] sm:$0xf] }
 0xd49   : > { %1970 = vrot.lane.b32.xlu0 %v1964_v62, %s2611_s29  ;;  %v1963_v12 = vld [vmem:[#allocation5 + $0x7] sm:$0xf]  ;;  %s3321_s29 = scalar_lea.sflag [#allocation9], %s2070_s28 }
 0xd9b   : > { %v1967_v11 = vpop.permute.xlu2 %1966 }
 0xd9c   : > { %v1973_v13 = vsel %vm1315_vm12, %v1963_v12, %v1967_v11 }
 0xdbb   : > { %v1971_v14 = vpop.permute.xlu0 %1970 }
 0xdbc   : > { %v1974_v15 = vsel %vm1874_vm15, %v1973_v13, %v1971_v14 }
 0xdbd   : > { %2396 = vmatmul.msk.f32.vlgmr.msrb.gmra.mxu0 %vm1934_vm13, %v1974_v15 }
 0xe3a   : > { %v2013_v17 = vpop.f32.mrf.mxu0 }
 0xe3b   : > { %v2014_v18 = vadd.f32 %v2479_v16, %v2013_v17 }
 0xe3d   : > { %v2016_v19 = vadd.f32 %v2014_v18, %v1961_v61 }
 0xe3f   : > { %vm2017_vm3 = vcmp.gt.f32.partialorder %v2016_v19, 0.0  ;;  %v2018_v20 = vmul.f32 0.2, %v2016_v19 }
 0xe41   : > { %v2019_v21 = vsel %vm2017_vm3, %v2016_v19, %v2018_v20 }
 0xe42   : > { %2020 = vst.msk [vmem:[#allocation5 + $0x8] sm:$0xf] %vm1902_vm11, %v2019_v21  ;;  %2397 = vmatmul.msk.f32.vlgmr.msrb.gmra.mxu1 %vm1315_vm12, %v2019_v21 }
 0xe43   : > { %2021 = vst.msk [vmem:[%s728_s0] sm:$0xf] %vm1902_vm11, %v2019_v21 }
 0xe44   : > { %2508 = shalt.err (!%p2505_p3)
}
 0xe45   : > { %2413 = dma.vmem_to_hbm [thread:$0]  (%p2772_p5), %s2109_s6, 64, %s2111_s27, %s3321_s29  }
 0xe46   : > { %s2092_s3 = scalar_lea.hbm %s3410_s21, %s2401_s1  ;;  %s2094_s0 = sshll.u32 %s3160_s4, 4  ;;  %s2095_s0 = int_to_ptr.vmem [resolvable:$true] %s2094_s0 }
 0xe47   : > { %s2096_s9 = sshll.u32 %s2092_s3, 4  ;;  %s2066_s11 = scalar_lea.sflag [#allocation7], %s3156_s8  ;;  %s2097_s9 = int_to_ptr.hbm [resolvable:$true] %s2096_s9 }
 0xe48   : > { %s2523_s12 = sshra.s32 %s2097_s9, 4  ;;  %s2529_s6 = scalar_lea.hbm %s3410_s21, 16  ;;  %s2524_s12 = int_to_ptr.hbm [resolvable:$true] %s2523_s12 }
 0xe49   : > { %s2525_s26 = scalar_lea.hbm %s2524_s12, 8  ;;  %p2530_p9 = scmp.lt.s32.totalorder %s2524_s12, %s3410_s21 }
 0xe4a   : > { %p2526_p4 = scmp.ne.s32.totalorder %s2524_s12, %s2525_s26  ;;  %p2531_p10 = scmp.lt.s32.totalorder %s2529_s6, %s2525_s26 }
 0xe4c   : > { %p2527_p7 = pnand %p2526_p4, %p2772_p5  ;;  %p2532_p11 = por %p2531_p10, %p2530_p9 }
 0xe4e   : > { %p2528_p8 = pneg %p2527_p7 }
 0xe50   : > { %p2533_p12 = pnand %p2532_p11, %p2528_p8 }
 0xe52   : > { %2536 = shalt.err (!%p2533_p12)
}
 0xe53   : > { %2412 = dma.vmem_to_hbm [thread:$0]  (%p2772_p5), %s2095_s0, 128, %s2097_s9, %s2066_s11   ;;  %v2480_v22 = vld [vmem:[%s3407_s18] ss:$0 sm:$0xff]  ;;  %vm2053_vm12 = vcmask 125952  }
 0xe54   : > { %s3478_s4 = sshll.u32 %s2753_s5, 2  ;;  %s3479_s13 = sshll.u32 %s3156_s8, 2 }
 0xe55   : > { %s2120_s28 = scalar_lea.hbm %s3412_s23, %s3478_s4  ;;  %s735_s12 = scalar_lea.vmem [#allocation10], %s3479_s13 }
 0xe56   : > { %s2122_s26 = sshll.u32 %s735_s12, 4  ;;  %s2124_s2 = sshll.u32 %s2120_s28, 4  ;;  %s2123_s26 = int_to_ptr.vmem [resolvable:$true] %s2122_s26  ;;  %s2125_s2 = int_to_ptr.hbm [resolvable:$true] %s2124_s2 }
 0xe57   : > { %s2551_s5 = sshra.s32 %s2125_s2, 4  ;;  %s2557_s8 = scalar_lea.hbm %s3412_s23, 8  ;;  %s2552_s5 = int_to_ptr.hbm [resolvable:$true] %s2551_s5 }
 0xe58   : > { %s2553_s0 = scalar_lea.hbm %s2552_s5, 4  ;;  %p2558_p2 = scmp.lt.s32.totalorder %s2552_s5, %s3412_s23 }
 0xe59   : > { %p2554_p13 = scmp.ne.s32.totalorder %s2552_s5, %s2553_s0  ;;  %p2559_p3 = scmp.lt.s32.totalorder %s2557_s8, %s2553_s0 }
 0xe5b   : > { %p2555_p0 = pnand %p2554_p13, %p2772_p5  ;;  %p2560_p4 = por %p2559_p3, %p2558_p2 }
 0xe5d   : > { %p2556_p1 = pneg %p2555_p0 }
 0xe5f   : > { %p2561_p7 = pnand %p2560_p4, %p2556_p1 }
 0xebf   : > { %v2050_v23 = vpop.f32.mrf.mxu1 }
 0xec0   : > { %v2051_v24 = vadd.f32 %v2480_v22, %v2050_v23 }
 0xec2   : > { %2054 = vst.msk [vmem:[%s735_s12] sm:$0xf] %vm2053_vm12, %v2051_v24 }
 0xec3   : > { %2564 = shalt.err (!%p2561_p7)
}
 0xec4   : > { %2414 = dma.vmem_to_hbm [thread:$0]  (%p2772_p5), %s2123_s26, 64, %s2125_s2, %s3321_s29  }
 0xec5 PF: > { %s3480_s4 = sld [smem:[#allocation13_spill]]  ;;  %p2428_p8 = scmp.ge.s32.totalorder %s2603_s25, 2 }
 0xec7   : > { %p2419_p9 = pnand %p2428_p8, %p2776_p6 }
 0xec9   : > { %p2420_p10 = pneg %p2419_p9 }
 0xecb   : > { %s2152_s10 = sand.u32 1, %s3480_s4  }
 0xecc   : > { %s2153_s28 = scalar_lea.sflag [#allocation7], %s2152_s10 }
 0xecd   : > { %2582 = dma.done.wait (%p2420_p10), %s2153_s28, 128  }
 0xece   : > { %2584 = vsyncadd (%p2420_p10), %s2153_s28, 4294967168  ;;  %s3482_s3 = sadd.s32 4294967294, %s2603_s25  }
 0xecf   : > { %s2162_s24 = sand.u32 1, %s3482_s3  }
 0xed0   : > { %s2163_s13 = scalar_lea.sflag [#allocation9], %s2162_s24 }
 0xed1   : > { %2586 = dma.done.wait (%p2420_p10), %s2163_s13, 128  }
 0xed2   : > { %2588 = vsyncadd (%p2420_p10), %s2163_s13, 4294967168  ;;  %s3483_s25 = sld [smem:[#allocation15_spill]]  ;;  %s3486_s4 = smov %s2595_s30 }
 0xed3   : > { %s3484_s7 = sld [smem:[#allocation14_spill]] }
 0xed4   : > { %s3485_s24 = sld [smem:[#allocation16_spill]] }
 0xed8   : > { %p37_p5 = scmp.ge.s32.totalorder %s3483_s25, 4  }
 0xed9   : > { %s3487_s30 = smov %s3484_s7 }
 0xeda   :  { %39 = sbr.rel (!%p37_p5) target bundleno = 20 (0x14), region = 195 }
 0xedf   :  { %2179 = vsyncpa [#allocation7], 1 }
 0xee0   :  { %2181 = vsyncpa [#allocation7 + $0x1], 1 }
 0xee1   :  { %2182 = vsyncpa [#allocation9], 1 }
 0xee2   :  { %2184 = vsyncpa [#allocation9 + $0x1], 1 }

</bundles_post_ra>
